<compile_context>
chip_gen: v7x
topology: tpu7x:2x2x1
jax: 0.10.0
libtpu: 0.0.40
codegen_flags: <defaults>
</compile_context>

<pallas_src>
import jax
import jax.numpy as jnp
from jax.experimental import pallas as pl
from jax.experimental.pallas import tpu as pltpu

_UNROLL_LIMIT = 16   # full Python unroll up to this T; partial-unroll fori_loop beyond


def _round_up(x, m):
    return (x + m - 1) // m * m


def lstm_tabular_kernel(x_ref, xs_ref,
                        w_ih0_ref, w_hh0_ref, b0_ref,
                        w_l1_ref, b1_ref,
                        w_s_ref, b_s_ref,
                        w_f1a_ref, w_f1b_ref, b_f1_ref,
                        w_f2_ref, b_f2_ref,
                        out_ref,
                        g0_ref, hh_ref):
    """One batch tile.

    x_ref  : (T*Bt, D) bf16, rows ordered time-major (row = t*Bt + b_local)
    xs_ref : (Bt, S)   bf16
    out_ref: (Bt, OUT_PAD) f32 (lane-dense, zero-padded columns)
    g0_ref : (T*Bt, 4H) f32 VMEM scratch: precomputed layer-0 input projection
    hh_ref : (Bt, 2H)  bf16 VMEM scratch: persistent [h0 | h1] MXU-operand buffer
    """
    TB, D = x_ref.shape
    Bt = out_ref.shape[0]
    T = TB // Bt
    H = w_hh0_ref.shape[0]
    cdt = w_hh0_ref.dtype                      # bf16 MXU-operand dtype (accum stays f32)

    # (1) Hoisted layer-0 input projection + bias: ONE MXU call for all T steps.
    #     x already arrives in bf16 from the wrapper -> no in-kernel cast.
    g0_ref[...] = (
        jnp.dot(x_ref[...], w_ih0_ref[...], preferred_element_type=jnp.float32)
        + b0_ref[...])

    # Hoist loop-resident weights / broadcasts out of the recurrence.
    w_hh0 = w_hh0_ref[...]
    w_l1 = w_l1_ref[...]
    b1_b = jnp.broadcast_to(b1_ref[...], (Bt, 4 * H))      # (2) hoisted broadcast

    def lstm_act(gates, c):
        # PyTorch gate order (i, f, g, o). Elementwise + transcendentals kept in f32.
        i = jax.nn.sigmoid(gates[:, 0 * H:1 * H])
        f = jax.nn.sigmoid(gates[:, 1 * H:2 * H])
        g = jnp.tanh(gates[:, 2 * H:3 * H])
        o = jax.nn.sigmoid(gates[:, 3 * H:4 * H])
        c_new = f * c + i * g
        h_new = o * jnp.tanh(c_new)
        return h_new, c_new

    # (3) Persistent bf16 [h0 | h1] buffer; c carries stay f32 values.
    hh_ref[...] = jnp.zeros_like(hh_ref)
    c0 = jnp.zeros((Bt, H), jnp.float32)
    c1 = jnp.zeros((Bt, H), jnp.float32)

    def step(row0, c0, c1):
        # layer 0: only the recurrent matmul is on the serial path.
        gates0 = g0_ref[pl.ds(row0, Bt), :] + jnp.dot(
            hh_ref[:, 0:H], w_hh0, preferred_element_type=jnp.float32)
        h0, c0 = lstm_act(gates0, c0)
        hh_ref[:, 0:H] = h0.astype(cdt)
        # layer 1: one fused MXU call over the lane-dense 2H = 128 concat buffer.
        # (inter-layer Dropout(0.2) is identity at inference)
        gates1 = jnp.dot(hh_ref[...], w_l1, preferred_element_type=jnp.float32) + b1_b
        h1, c1 = lstm_act(gates1, c1)
        hh_ref[:, H:2 * H] = h1.astype(cdt)
        return c0, c1

    if T <= _UNROLL_LIMIT:
        # (4a) Fully unrolled recurrence: static trip count, static slice starts.
        for t in range(T):
            c0, c1 = step(t * Bt, c0, c1)
    else:
        # (4b) Long sequences: partial unroll bounds code size / vreg pressure.
        def body(t, carry):
            c0_, c1_ = carry
            return step(pl.multiple_of(t * Bt, Bt), c0_, c1_)
        c0, c1 = jax.lax.fori_loop(0, T, body, (c0, c1), unroll=8)

    # fc_static: Linear + ReLU (+ identity dropout); xs already bf16.
    static_h = jnp.maximum(
        jnp.dot(xs_ref[...], w_s_ref[...], preferred_element_type=jnp.float32)
        + b_s_ref[...], 0.0)

    # fc_final[0] on concat([h_lstm, static_h]) realized as a split matmul.
    # h1 (last timestep of top layer) is read straight from the bf16 buffer.
    hidden = jnp.maximum(
        jnp.dot(hh_ref[:, H:2 * H], w_f1a_ref[...], preferred_element_type=jnp.float32)
        + jnp.dot(static_h.astype(cdt), w_f1b_ref[...], preferred_element_type=jnp.float32)
        + b_f1_ref[...], 0.0)

    # fc_final[2]; columns are zero-padded to 128 lanes -> unmasked, lane-dense store.
    out_ref[...] = (jnp.dot(hidden.astype(cdt), w_f2_ref[...],
                            preferred_element_type=jnp.float32) + b_f2_ref[...])


def lstm_with_tabular(x_seq, x_static, packed, *, b_tile_max=256, min_tiles=1):
    """x_seq: (B, T, D) batch-first (like PyTorch); x_static: (B, S).
    `packed` comes from pack_params().

    b_tile_max: batch-tile cap. 256 fills the v6e/v7x 256-deep MXU; >=128 suffices on
        v5e; can be raised to 512 on v6e (128 MiB VMEM) for large B / small T.
    min_tiles : set to 2 on v7x (2 TensorCores/chip) when B is large enough, so the
        "parallel" grid axis shards across both cores.
    """
    B, T, D = x_seq.shape
    S = x_static.shape[1]
    H = packed["w_hh0"].shape[0]
    OUT_PAD = packed["w_f2"].shape[1]
    out_dim = packed["out_dim"]
    mxu_dtype = packed["w_hh0"].dtype
    itemsize = jnp.dtype(mxu_dtype).itemsize

    # Batch tile: sublane multiple, capped, optionally split for multi-core chips.
    b_tile = min(_round_up(B, 8), b_tile_max)
    if min_tiles > 1:
        b_tile = min(b_tile, max(8, _round_up(-(-B // min_tiles), 8)))
    b_pad = _round_up(B, b_tile)
    n_tiles = b_pad // b_tile

    # (opt 1) Single materialized padding copy of x_seq, cast to bf16 in the same pass
    # (halves pre-kernel HBM traffic and the lane-padded VMEM footprint of the x tile);
    # the per-tile time-major regrouping rides on the same copy.
    x_p = jnp.zeros((b_pad, T, D), mxu_dtype).at[:B].set(x_seq.astype(mxu_dtype))
    x_tiles = jnp.reshape(
        jnp.transpose(jnp.reshape(x_p, (n_tiles, b_tile, T, D)), (0, 2, 1, 3)),
        (n_tiles, T * b_tile, D))                                 # row = t*b_tile + b
    xs_p = jnp.zeros((b_pad, S), mxu_dtype).at[:B].set(x_static.astype(mxu_dtype))

    weights = (packed["w_ih0"], packed["w_hh0"], packed["b0"],
               packed["w_l1"], packed["b1"],
               packed["w_s"], packed["b_s"],
               packed["w_f1a"], packed["w_f1b"], packed["b_f1"],
               packed["w_f2"], packed["b_f2"])

    in_specs = ([pl.BlockSpec((None, T * b_tile, D), lambda i: (i, 0, 0)),
                 pl.BlockSpec((b_tile, S), lambda i: (i, 0))]
                + [pl.BlockSpec(w.shape, lambda i: (0, 0)) for w in weights])
    # NOTE: weight blocks have constant index maps; leaving default double-buffering
    # (a few hundred KiB) — only worth trimming on v7x once b_tile/T are pushed up.

    # (opt 5) Explicit VMEM budget (lane-padding to 128 accounted for), clamped to the
    # smallest-chip physical VMEM (v7x: 64 MiB).
    lane = 128
    vmem_est = (
        2 * T * b_tile * max(D, lane) * itemsize          # x tile, double-buffered
        + 2 * b_tile * max(S, lane) * itemsize            # xs tile, double-buffered
        + T * b_tile * 4 * H * 4                          # g0 scratch (f32)
        + b_tile * 2 * H * itemsize                       # hh scratch (bf16)
        + 2 * b_tile * OUT_PAD * 4                        # output tile, double-buffered
        + 2 * sum(int(w.size) * w.dtype.itemsize for w in weights))
    vmem_limit = int(min(max(2 * vmem_est, 32 * 2 ** 20), 64 * 2 ** 20))

    # Advisory cost estimate so XLA schedules the custom call sensibly.
    flops = int(2 * b_pad * T * (D * 4 * H + H * 4 * H + 2 * H * 4 * H)
                + 2 * b_pad * (S * 32 + H * 64 + 32 * 64 + 64 * OUT_PAD))
    transcendentals = int(10 * H * T * b_pad)             # 3 sigmoid + 2 tanh per cell
    inputs = (x_tiles, xs_p) + weights
    bytes_accessed = int(sum(a.size * a.dtype.itemsize for a in inputs)
                         + b_pad * OUT_PAD * 4)

    out = pl.pallas_call(
        lstm_tabular_kernel,
        out_shape=jax.ShapeDtypeStruct((b_pad, OUT_PAD), jnp.float32),
        grid_spec=pltpu.PrefetchScalarGridSpec(
            num_scalar_prefetch=0,
            grid=(n_tiles,),
            in_specs=in_specs,
            out_specs=pl.BlockSpec((b_tile, OUT_PAD), lambda i: (i, 0)),
            scratch_shapes=[pltpu.VMEM((T * b_tile, 4 * H), jnp.float32),
                            pltpu.VMEM((b_tile, 2 * H), mxu_dtype)],
        ),
        compiler_params=pltpu.CompilerParams(
            dimension_semantics=("parallel",),
            vmem_limit_bytes=vmem_limit),
        cost_estimate=pl.CostEstimate(flops=flops,
                                      transcendentals=transcendentals,
                                      bytes_accessed=bytes_accessed),
    )(*inputs)
    return out[:B, :out_dim]


def init_params(key, input_dim_seq, hidden_dim, input_dim_static, output_dim):
    """Logical (PyTorch-equivalent) f32 parameters, linear weights pre-transposed
    to (in_features, out_features)."""
    H = hidden_dim
    ks = jax.random.split(key, 13)
    s = 0.1

    def w(k, shape):
        return (s * jax.random.normal(k, shape)).astype(jnp.float32)

    return {
        # LSTM layer 0 (weight_ih_l0 / weight_hh_l0 stored transposed)
        "w_ih0": w(ks[0], (input_dim_seq, 4 * H)),
        "w_hh0": w(ks[1], (H, 4 * H)),
        "b0":    w(ks[2], (1, 4 * H)),           # b_ih_l0 + b_hh_l0 folded
        # LSTM layer 1
        "w_ih1": w(ks[3], (H, 4 * H)),
        "w_hh1": w(ks[4], (H, 4 * H)),
        "b1":    w(ks[5], (1, 4 * H)),
        # fc_static: Linear(S, 32)
        "w_s":   w(ks[6], (input_dim_static, 32)),
        "b_s":   w(ks[7], (1, 32)),
        # fc_final[0]: Linear(H+32, 64), split into lstm part and static part
        "w_f1a": w(ks[8], (H, 64)),
        "w_f1b": w(ks[9], (32, 64)),
        "b_f1":  w(ks[10], (1, 64)),
        # fc_final[2]: Linear(64, output_dim)
        "w_f2":  w(ks[11], (64, output_dim)),
        "b_f2":  w(ks[12], (1, output_dim)),
    }


def pack_params(p, mxu_dtype=jnp.bfloat16):
    """Kernel-ready parameters:
      * weight matrices cast to `mxu_dtype` (bf16 MXU operands, f32 accumulation);
        biases stay f32 (added post-accumulation), gates/c state stay f32 in-kernel.
      * layer-1 input & recurrent weights pre-stacked into one (2H, 4H) operand.
      * final layer zero-padded to a lane-dense 128-wide output."""
    out_dim = p["w_f2"].shape[1]
    opad = _round_up(max(out_dim, 128), 128)
    w_f2 = jnp.zeros((p["w_f2"].shape[0], opad), jnp.float32).at[:, :out_dim].set(p["w_f2"])
    b_f2 = jnp.zeros((1, opad), jnp.float32).at[:, :out_dim].set(p["b_f2"])
    cast = lambda a: a.astype(mxu_dtype)
    return {
        "w_ih0": cast(p["w_ih0"]),
        "w_hh0": cast(p["w_hh0"]),
        "b0":    p["b0"],
        "w_l1":  cast(jnp.concatenate([p["w_ih1"], p["w_hh1"]], axis=0)),   # (2H, 4H)
        "b1":    p["b1"],
        "w_s":   cast(p["w_s"]),
        "b_s":   p["b_s"],
        "w_f1a": cast(p["w_f1a"]),
        "w_f1b": cast(p["w_f1b"]),
        "b_f1":  p["b_f1"],
        "w_f2":  cast(w_f2),
        "b_f2":  b_f2,
        "out_dim": out_dim,
    }


def reference_forward(x_seq, x_static, p, mxu_dtype=jnp.bfloat16):
    """Pure-JAX reference mirroring the PyTorch module (eval mode), with the same
    bf16-at-MXU-boundary / f32-accumulation convention as the kernel."""
    H = p["w_hh0"].shape[0]

    def mm(a, w):
        return jnp.dot(a.astype(mxu_dtype), w.astype(mxu_dtype),
                       preferred_element_type=jnp.float32)

    def cell(x, h, c, w_ih, w_hh, b):
        g = mm(x, w_ih) + mm(h, w_hh) + b
        i = jax.nn.sigmoid(g[:, :H]); f = jax.nn.sigmoid(g[:, H:2 * H])
        gg = jnp.tanh(g[:, 2 * H:3 * H]); o = jax.nn.sigmoid(g[:, 3 * H:])
        c = f * c + i * gg
        return o * jnp.tanh(c), c

    B, T, _ = x_seq.shape
    h0 = c0 = h1 = c1 = jnp.zeros((B, H), jnp.float32)
    for t in range(T):
        h0, c0 = cell(x_seq[:, t, :], h0, c0, p["w_ih0"], p["w_hh0"], p["b0"])
        h1, c1 = cell(h0, h1, c1, p["w_ih1"], p["w_hh1"], p["b1"])
    static_h = jnp.maximum(mm(x_static, p["w_s"]) + p["b_s"], 0.0)
    hidden = jnp.maximum(mm(h1, p["w_f1a"]) + mm(static_h, p["w_f1b"]) + p["b_f1"], 0.0)
    return mm(hidden, p["w_f2"]) + p["b_f2"]


if __name__ == "__main__":
    # Small shapes consistent with the module
    B, T = 4, 8
    input_dim_seq = 16       # X_seq.shape[2]
    hidden_dim = 64
    input_dim_static = 16    # X_static.shape[1]
    output_dim = 4           # len(dataset.csv_data['sii'].unique())

    key = jax.random.PRNGKey(0)
    k_seq, k_stat, k_params = jax.random.split(key, 3)

    x_seq = jax.random.normal(k_seq, (B, T, input_dim_seq), dtype=jnp.float32)
    x_static = jax.random.normal(k_stat, (B, input_dim_static), dtype=jnp.float32)
    params = init_params(k_params, input_dim_seq, hidden_dim, input_dim_static, output_dim)
    packed = pack_params(params)

    out = lstm_with_tabular(x_seq, x_static, packed)
    out = jax.block_until_ready(out)

    ref = reference_forward(x_seq, x_static, params)
    assert out.shape == (B, output_dim)
    assert jnp.allclose(out, ref, atol=2e-3, rtol=2e-3), "mismatch vs pure-JAX reference"

    print("KERNEL_OK")
</pallas_src>

<mosaic_0001>
module attributes {stable_mosaic.version = 11 : i64} {
  func.func @lstm_tabular_kernel(%arg0: i32, %arg1: memref<1x64x16xbf16, #tpu.memory_space<vmem>>, %arg2: memref<8x16xbf16, #tpu.memory_space<vmem>>, %arg3: memref<16x256xbf16, #tpu.memory_space<vmem>>, %arg4: memref<64x256xbf16, #tpu.memory_space<vmem>>, %arg5: memref<1x256xf32, #tpu.memory_space<vmem>>, %arg6: memref<128x256xbf16, #tpu.memory_space<vmem>>, %arg7: memref<1x256xf32, #tpu.memory_space<vmem>>, %arg8: memref<16x32xbf16, #tpu.memory_space<vmem>>, %arg9: memref<1x32xf32, #tpu.memory_space<vmem>>, %arg10: memref<64x64xbf16, #tpu.memory_space<vmem>>, %arg11: memref<32x64xbf16, #tpu.memory_space<vmem>>, %arg12: memref<1x64xf32, #tpu.memory_space<vmem>>, %arg13: memref<64x128xbf16, #tpu.memory_space<vmem>>, %arg14: memref<1x128xf32, #tpu.memory_space<vmem>>, %arg15: memref<8x128xf32, #tpu.memory_space<vmem>>, %arg16: memref<64x256xf32, #tpu.memory_space<vmem>>, %arg17: memref<8x128xbf16, #tpu.memory_space<vmem>>) attributes {dimension_semantics = [#tpu.dimension_semantics<parallel>], iteration_bounds = array<i64: 1>, scalar_prefetch = 0 : i64, scratch_operands = 2 : i64, tpu.core_type = #tpu.core_type<tc>, window_params = [{transform_indices = @transform_0, window_bounds = array<i64: 1, 64, 16>}, {transform_indices = @transform_1, window_bounds = array<i64: 8, 16>}, {pipeline_mode = #tpu.pipeline_mode<synchronous>, transform_indices = @transform_2, window_bounds = array<i64: 16, 256>}, {pipeline_mode = #tpu.pipeline_mode<synchronous>, transform_indices = @transform_3, window_bounds = array<i64: 64, 256>}, {pipeline_mode = #tpu.pipeline_mode<synchronous>, transform_indices = @transform_4, window_bounds = array<i64: 1, 256>}, {pipeline_mode = #tpu.pipeline_mode<synchronous>, transform_indices = @transform_5, window_bounds = array<i64: 128, 256>}, {pipeline_mode = #tpu.pipeline_mode<synchronous>, transform_indices = @transform_6, window_bounds = array<i64: 1, 256>}, {pipeline_mode = #tpu.pipeline_mode<synchronous>, transform_indices = @transform_7, window_bounds = array<i64: 16, 32>}, {pipeline_mode = #tpu.pipeline_mode<synchronous>, transform_indices = @transform_8, window_bounds = array<i64: 1, 32>}, {pipeline_mode = #tpu.pipeline_mode<synchronous>, transform_indices = @transform_9, window_bounds = array<i64: 64, 64>}, {pipeline_mode = #tpu.pipeline_mode<synchronous>, transform_indices = @transform_10, window_bounds = array<i64: 32, 64>}, {pipeline_mode = #tpu.pipeline_mode<synchronous>, transform_indices = @transform_11, window_bounds = array<i64: 1, 64>}, {pipeline_mode = #tpu.pipeline_mode<synchronous>, transform_indices = @transform_12, window_bounds = array<i64: 64, 128>}, {pipeline_mode = #tpu.pipeline_mode<synchronous>, transform_indices = @transform_13, window_bounds = array<i64: 1, 128>}, {transform_indices = @transform_14, window_bounds = array<i64: 8, 128>}]} {
    %c0 = arith.constant 0 : index
    %c0_0 = arith.constant 0 : index
    %c0_1 = arith.constant 0 : index
    %0 = vector.load %arg1[%c0, %c0_0, %c0_1] : memref<1x64x16xbf16, #tpu.memory_space<vmem>>, vector<1x64x16xbf16>
    %1 = vector.shape_cast %0 : vector<1x64x16xbf16> to vector<64x16xbf16>
    %c0_2 = arith.constant 0 : index
    %c0_3 = arith.constant 0 : index
    %2 = vector.load %arg3[%c0_2, %c0_3] : memref<16x256xbf16, #tpu.memory_space<vmem>>, vector<16x256xbf16>
    %cst = arith.constant dense<0.000000e+00> : vector<64x256xf32>
    %3 = tpu.matmul %1, %2, %cst {dimension_numbers = #tpu.dot_dimension_numbers<[1], [0], [0], [1], [0, 0, 1, 1], [], []>} : vector<64x16xbf16>, vector<16x256xbf16>, vector<64x256xf32> -> vector<64x256xf32>
    %c0_4 = arith.constant 0 : index
    %c0_5 = arith.constant 0 : index
    %4 = vector.load %arg5[%c0_4, %c0_5] : memref<1x256xf32, #tpu.memory_space<vmem>>, vector<1x256xf32>
    %5 = vector.broadcast %4 : vector<1x256xf32> to vector<64x256xf32>
    %6 = arith.addf %3, %5 : vector<64x256xf32>
    %c0_6 = arith.constant 0 : index
    %c0_7 = arith.constant 0 : index
    %7 = vector.load %arg16[%c0_6, %c0_7] : memref<64x256xf32, #tpu.memory_space<vmem>>, vector<64x256xf32>
    tpu.vector_store %arg16[%c0_6, %c0_7], %6 {strides = array<i32>} : memref<64x256xf32, #tpu.memory_space<vmem>>, vector<64x256xf32>,
    %c0_8 = arith.constant 0 : index
    %c0_9 = arith.constant 0 : index
    %8 = vector.load %arg4[%c0_8, %c0_9] : memref<64x256xbf16, #tpu.memory_space<vmem>>, vector<64x256xbf16>
    %c0_10 = arith.constant 0 : index
    %c0_11 = arith.constant 0 : index
    %9 = vector.load %arg6[%c0_10, %c0_11] : memref<128x256xbf16, #tpu.memory_space<vmem>>, vector<128x256xbf16>
    %c0_12 = arith.constant 0 : index
    %c0_13 = arith.constant 0 : index
    %10 = vector.load %arg7[%c0_12, %c0_13] : memref<1x256xf32, #tpu.memory_space<vmem>>, vector<1x256xf32>
    %11 = vector.shape_cast %10 : vector<1x256xf32> to vector<1x256xf32>
    %12 = vector.broadcast %11 : vector<1x256xf32> to vector<8x256xf32>
    %cst_14 = arith.constant 0.000000e+00 : bf16
    %13 = vector.broadcast %cst_14 : bf16 to vector<8x128xbf16>
    %c0_15 = arith.constant 0 : index
    %c0_16 = arith.constant 0 : index
    %14 = vector.load %arg17[%c0_15, %c0_16] : memref<8x128xbf16, #tpu.memory_space<vmem>>, vector<8x128xbf16>
    tpu.vector_store %arg17[%c0_15, %c0_16], %13 {strides = array<i32>} : memref<8x128xbf16, #tpu.memory_space<vmem>>, vector<8x128xbf16>,
    %cst_17 = arith.constant 0.000000e+00 : f32
    %15 = vector.broadcast %cst_17 : f32 to vector<8x64xf32>
    %cst_18 = arith.constant 0.000000e+00 : f32
    %16 = vector.broadcast %cst_18 : f32 to vector<8x64xf32>
    %c0_19 = arith.constant 0 : index
    %c0_20 = arith.constant 0 : index
    %17 = vector.load %arg16[%c0_19, %c0_20] : memref<64x256xf32, #tpu.memory_space<vmem>>, vector<8x256xf32>
    %c0_21 = arith.constant 0 : index
    %c0_22 = arith.constant 0 : index
    %18 = vector.load %arg17[%c0_21, %c0_22] : memref<8x128xbf16, #tpu.memory_space<vmem>>, vector<8x64xbf16>
    %cst_23 = arith.constant dense<0.000000e+00> : vector<8x256xf32>
    %19 = tpu.matmul %18, %8, %cst_23 {dimension_numbers = #tpu.dot_dimension_numbers<[1], [0], [0], [1], [0, 0, 1, 1], [], []>} : vector<8x64xbf16>, vector<64x256xbf16>, vector<8x256xf32> -> vector<8x256xf32>
    %20 = arith.addf %17, %19 : vector<8x256xf32>
    %21 = vector.extract_strided_slice %20 {offsets = [0, 0], sizes = [8, 64], strides = [1, 1]} : vector<8x256xf32> to vector<8x64xf32>
    %22 = arith.negf %21 : vector<8x64xf32>
    %23 = math.exp %22 : vector<8x64xf32>
    %cst_24 = arith.constant 1.000000e+00 : f32
    %24 = vector.broadcast %cst_24 : f32 to vector<8x64xf32>
    %25 = arith.addf %24, %23 : vector<8x64xf32>
    %26 = arith.divf %24, %25 : vector<8x64xf32>
    %27 = vector.extract_strided_slice %20 {offsets = [0, 64], sizes = [8, 64], strides = [1, 1]} : vector<8x256xf32> to vector<8x64xf32>
    %28 = arith.negf %27 : vector<8x64xf32>
    %29 = math.exp %28 : vector<8x64xf32>
    %cst_25 = arith.constant 1.000000e+00 : f32
    %30 = vector.broadcast %cst_25 : f32 to vector<8x64xf32>
    %31 = arith.addf %30, %29 : vector<8x64xf32>
    %32 = arith.divf %30, %31 : vector<8x64xf32>
    %33 = vector.extract_strided_slice %20 {offsets = [0, 128], sizes = [8, 64], strides = [1, 1]} : vector<8x256xf32> to vector<8x64xf32>
    %34 = math.tanh %33 : vector<8x64xf32>
    %35 = vector.extract_strided_slice %20 {offsets = [0, 192], sizes = [8, 64], strides = [1, 1]} : vector<8x256xf32> to vector<8x64xf32>
    %36 = arith.negf %35 : vector<8x64xf32>
    %37 = math.exp %36 : vector<8x64xf32>
    %cst_26 = arith.constant 1.000000e+00 : f32
    %38 = vector.broadcast %cst_26 : f32 to vector<8x64xf32>
    %39 = arith.addf %38, %37 : vector<8x64xf32>
    %40 = arith.divf %38, %39 : vector<8x64xf32>
    %41 = arith.mulf %32, %15 : vector<8x64xf32>
    %42 = arith.mulf %26, %34 : vector<8x64xf32>
    %43 = arith.addf %41, %42 : vector<8x64xf32>
    %44 = math.tanh %43 : vector<8x64xf32>
    %45 = arith.mulf %40, %44 : vector<8x64xf32>
    %46 = arith.truncf %45 : vector<8x64xf32> to vector<8x64xbf16>
    %c0_27 = arith.constant 0 : index
    %c0_28 = arith.constant 0 : index
    %47 = vector.load %arg17[%c0_27, %c0_28] : memref<8x128xbf16, #tpu.memory_space<vmem>>, vector<8x64xbf16>
    tpu.vector_store %arg17[%c0_27, %c0_28], %46 {strides = array<i32>} : memref<8x128xbf16, #tpu.memory_space<vmem>>, vector<8x64xbf16>,
    %c0_29 = arith.constant 0 : index
    %c0_30 = arith.constant 0 : index
    %48 = vector.load %arg17[%c0_29, %c0_30] : memref<8x128xbf16, #tpu.memory_space<vmem>>, vector<8x128xbf16>
    %cst_31 = arith.constant dense<0.000000e+00> : vector<8x256xf32>
    %49 = tpu.matmul %48, %9, %cst_31 {dimension_numbers = #tpu.dot_dimension_numbers<[1], [0], [0], [1], [0, 0, 1, 1], [], []>} : vector<8x128xbf16>, vector<128x256xbf16>, vector<8x256xf32> -> vector<8x256xf32>
    %50 = arith.addf %49, %12 : vector<8x256xf32>
    %51 = vector.extract_strided_slice %50 {offsets = [0, 0], sizes = [8, 64], strides = [1, 1]} : vector<8x256xf32> to vector<8x64xf32>
    %52 = arith.negf %51 : vector<8x64xf32>
    %53 = math.exp %52 : vector<8x64xf32>
    %cst_32 = arith.constant 1.000000e+00 : f32
    %54 = vector.broadcast %cst_32 : f32 to vector<8x64xf32>
    %55 = arith.addf %54, %53 : vector<8x64xf32>
    %56 = arith.divf %54, %55 : vector<8x64xf32>
    %57 = vector.extract_strided_slice %50 {offsets = [0, 64], sizes = [8, 64], strides = [1, 1]} : vector<8x256xf32> to vector<8x64xf32>
    %58 = arith.negf %57 : vector<8x64xf32>
    %59 = math.exp %58 : vector<8x64xf32>
    %cst_33 = arith.constant 1.000000e+00 : f32
    %60 = vector.broadcast %cst_33 : f32 to vector<8x64xf32>
    %61 = arith.addf %60, %59 : vector<8x64xf32>
    %62 = arith.divf %60, %61 : vector<8x64xf32>
    %63 = vector.extract_strided_slice %50 {offsets = [0, 128], sizes = [8, 64], strides = [1, 1]} : vector<8x256xf32> to vector<8x64xf32>
    %64 = math.tanh %63 : vector<8x64xf32>
    %65 = vector.extract_strided_slice %50 {offsets = [0, 192], sizes = [8, 64], strides = [1, 1]} : vector<8x256xf32> to vector<8x64xf32>
    %66 = arith.negf %65 : vector<8x64xf32>
    %67 = math.exp %66 : vector<8x64xf32>
    %cst_34 = arith.constant 1.000000e+00 : f32
    %68 = vector.broadcast %cst_34 : f32 to vector<8x64xf32>
    %69 = arith.addf %68, %67 : vector<8x64xf32>
    %70 = arith.divf %68, %69 : vector<8x64xf32>
    %71 = arith.mulf %62, %16 : vector<8x64xf32>
    %72 = arith.mulf %56, %64 : vector<8x64xf32>
    %73 = arith.addf %71, %72 : vector<8x64xf32>
    %74 = math.tanh %73 : vector<8x64xf32>
    %75 = arith.mulf %70, %74 : vector<8x64xf32>
    %76 = arith.truncf %75 : vector<8x64xf32> to vector<8x64xbf16>
    %c0_35 = arith.constant 0 : index
    %c64 = arith.constant 64 : index
    %77 = vector.load %arg17[%c0_35, %c64] : memref<8x128xbf16, #tpu.memory_space<vmem>>, vector<8x64xbf16>
    tpu.vector_store %arg17[%c0_35, %c64], %76 {strides = array<i32>} : memref<8x128xbf16, #tpu.memory_space<vmem>>, vector<8x64xbf16>,
    %c8 = arith.constant 8 : index
    %c0_36 = arith.constant 0 : index
    %78 = vector.load %arg16[%c8, %c0_36] : memref<64x256xf32, #tpu.memory_space<vmem>>, vector<8x256xf32>
    %c0_37 = arith.constant 0 : index
    %c0_38 = arith.constant 0 : index
    %79 = vector.load %arg17[%c0_37, %c0_38] : memref<8x128xbf16, #tpu.memory_space<vmem>>, vector<8x64xbf16>
    %cst_39 = arith.constant dense<0.000000e+00> : vector<8x256xf32>
    %80 = tpu.matmul %79, %8, %cst_39 {dimension_numbers = #tpu.dot_dimension_numbers<[1], [0], [0], [1], [0, 0, 1, 1], [], []>} : vector<8x64xbf16>, vector<64x256xbf16>, vector<8x256xf32> -> vector<8x256xf32>
    %81 = arith.addf %78, %80 : vector<8x256xf32>
    %82 = vector.extract_strided_slice %81 {offsets = [0, 0], sizes = [8, 64], strides = [1, 1]} : vector<8x256xf32> to vector<8x64xf32>
    %83 = arith.negf %82 : vector<8x64xf32>
    %84 = math.exp %83 : vector<8x64xf32>
    %cst_40 = arith.constant 1.000000e+00 : f32
    %85 = vector.broadcast %cst_40 : f32 to vector<8x64xf32>
    %86 = arith.addf %85, %84 : vector<8x64xf32>
    %87 = arith.divf %85, %86 : vector<8x64xf32>
    %88 = vector.extract_strided_slice %81 {offsets = [0, 64], sizes = [8, 64], strides = [1, 1]} : vector<8x256xf32> to vector<8x64xf32>
    %89 = arith.negf %88 : vector<8x64xf32>
    %90 = math.exp %89 : vector<8x64xf32>
    %cst_41 = arith.constant 1.000000e+00 : f32
    %91 = vector.broadcast %cst_41 : f32 to vector<8x64xf32>
    %92 = arith.addf %91, %90 : vector<8x64xf32>
    %93 = arith.divf %91, %92 : vector<8x64xf32>
    %94 = vector.extract_strided_slice %81 {offsets = [0, 128], sizes = [8, 64], strides = [1, 1]} : vector<8x256xf32> to vector<8x64xf32>
    %95 = math.tanh %94 : vector<8x64xf32>
    %96 = vector.extract_strided_slice %81 {offsets = [0, 192], sizes = [8, 64], strides = [1, 1]} : vector<8x256xf32> to vector<8x64xf32>
    %97 = arith.negf %96 : vector<8x64xf32>
    %98 = math.exp %97 : vector<8x64xf32>
    %cst_42 = arith.constant 1.000000e+00 : f32
    %99 = vector.broadcast %cst_42 : f32 to vector<8x64xf32>
    %100 = arith.addf %99, %98 : vector<8x64xf32>
    %101 = arith.divf %99, %100 : vector<8x64xf32>
    %102 = arith.mulf %93, %43 : vector<8x64xf32>
    %103 = arith.mulf %87, %95 : vector<8x64xf32>
    %104 = arith.addf %102, %103 : vector<8x64xf32>
    %105 = math.tanh %104 : vector<8x64xf32>
    %106 = arith.mulf %101, %105 : vector<8x64xf32>
    %107 = arith.truncf %106 : vector<8x64xf32> to vector<8x64xbf16>
    %c0_43 = arith.constant 0 : index
    %c0_44 = arith.constant 0 : index
    %108 = vector.load %arg17[%c0_43, %c0_44] : memref<8x128xbf16, #tpu.memory_space<vmem>>, vector<8x64xbf16>
    tpu.vector_store %arg17[%c0_43, %c0_44], %107 {strides = array<i32>} : memref<8x128xbf16, #tpu.memory_space<vmem>>, vector<8x64xbf16>,
    %c0_45 = arith.constant 0 : index
    %c0_46 = arith.constant 0 : index
    %109 = vector.load %arg17[%c0_45, %c0_46] : memref<8x128xbf16, #tpu.memory_space<vmem>>, vector<8x128xbf16>
    %cst_47 = arith.constant dense<0.000000e+00> : vector<8x256xf32>
    %110 = tpu.matmul %109, %9, %cst_47 {dimension_numbers = #tpu.dot_dimension_numbers<[1], [0], [0], [1], [0, 0, 1, 1], [], []>} : vector<8x128xbf16>, vector<128x256xbf16>, vector<8x256xf32> -> vector<8x256xf32>
    %111 = arith.addf %110, %12 : vector<8x256xf32>
    %112 = vector.extract_strided_slice %111 {offsets = [0, 0], sizes = [8, 64], strides = [1, 1]} : vector<8x256xf32> to vector<8x64xf32>
    %113 = arith.negf %112 : vector<8x64xf32>
    %114 = math.exp %113 : vector<8x64xf32>
    %cst_48 = arith.constant 1.000000e+00 : f32
    %115 = vector.broadcast %cst_48 : f32 to vector<8x64xf32>
    %116 = arith.addf %115, %114 : vector<8x64xf32>
    %117 = arith.divf %115, %116 : vector<8x64xf32>
    %118 = vector.extract_strided_slice %111 {offsets = [0, 64], sizes = [8, 64], strides = [1, 1]} : vector<8x256xf32> to vector<8x64xf32>
    %119 = arith.negf %118 : vector<8x64xf32>
    %120 = math.exp %119 : vector<8x64xf32>
    %cst_49 = arith.constant 1.000000e+00 : f32
    %121 = vector.broadcast %cst_49 : f32 to vector<8x64xf32>
    %122 = arith.addf %121, %120 : vector<8x64xf32>
    %123 = arith.divf %121, %122 : vector<8x64xf32>
    %124 = vector.extract_strided_slice %111 {offsets = [0, 128], sizes = [8, 64], strides = [1, 1]} : vector<8x256xf32> to vector<8x64xf32>
    %125 = math.tanh %124 : vector<8x64xf32>
    %126 = vector.extract_strided_slice %111 {offsets = [0, 192], sizes = [8, 64], strides = [1, 1]} : vector<8x256xf32> to vector<8x64xf32>
    %127 = arith.negf %126 : vector<8x64xf32>
    %128 = math.exp %127 : vector<8x64xf32>
    %cst_50 = arith.constant 1.000000e+00 : f32
    %129 = vector.broadcast %cst_50 : f32 to vector<8x64xf32>
    %130 = arith.addf %129, %128 : vector<8x64xf32>
    %131 = arith.divf %129, %130 : vector<8x64xf32>
    %132 = arith.mulf %123, %73 : vector<8x64xf32>
    %133 = arith.mulf %117, %125 : vector<8x64xf32>
    %134 = arith.addf %132, %133 : vector<8x64xf32>
    %135 = math.tanh %134 : vector<8x64xf32>
    %136 = arith.mulf %131, %135 : vector<8x64xf32>
    %137 = arith.truncf %136 : vector<8x64xf32> to vector<8x64xbf16>
    %c0_51 = arith.constant 0 : index
    %c64_52 = arith.constant 64 : index
    %138 = vector.load %arg17[%c0_51, %c64_52] : memref<8x128xbf16, #tpu.memory_space<vmem>>, vector<8x64xbf16>
    tpu.vector_store %arg17[%c0_51, %c64_52], %137 {strides = array<i32>} : memref<8x128xbf16, #tpu.memory_space<vmem>>, vector<8x64xbf16>,
    %c16 = arith.constant 16 : index
    %c0_53 = arith.constant 0 : index
    %139 = vector.load %arg16[%c16, %c0_53] : memref<64x256xf32, #tpu.memory_space<vmem>>, vector<8x256xf32>
    %c0_54 = arith.constant 0 : index
    %c0_55 = arith.constant 0 : index
    %140 = vector.load %arg17[%c0_54, %c0_55] : memref<8x128xbf16, #tpu.memory_space<vmem>>, vector<8x64xbf16>
    %cst_56 = arith.constant dense<0.000000e+00> : vector<8x256xf32>
    %141 = tpu.matmul %140, %8, %cst_56 {dimension_numbers = #tpu.dot_dimension_numbers<[1], [0], [0], [1], [0, 0, 1, 1], [], []>} : vector<8x64xbf16>, vector<64x256xbf16>, vector<8x256xf32> -> vector<8x256xf32>
    %142 = arith.addf %139, %141 : vector<8x256xf32>
    %143 = vector.extract_strided_slice %142 {offsets = [0, 0], sizes = [8, 64], strides = [1, 1]} : vector<8x256xf32> to vector<8x64xf32>
    %144 = arith.negf %143 : vector<8x64xf32>
    %145 = math.exp %144 : vector<8x64xf32>
    %cst_57 = arith.constant 1.000000e+00 : f32
    %146 = vector.broadcast %cst_57 : f32 to vector<8x64xf32>
    %147 = arith.addf %146, %145 : vector<8x64xf32>
    %148 = arith.divf %146, %147 : vector<8x64xf32>
    %149 = vector.extract_strided_slice %142 {offsets = [0, 64], sizes = [8, 64], strides = [1, 1]} : vector<8x256xf32> to vector<8x64xf32>
    %150 = arith.negf %149 : vector<8x64xf32>
    %151 = math.exp %150 : vector<8x64xf32>
    %cst_58 = arith.constant 1.000000e+00 : f32
    %152 = vector.broadcast %cst_58 : f32 to vector<8x64xf32>
    %153 = arith.addf %152, %151 : vector<8x64xf32>
    %154 = arith.divf %152, %153 : vector<8x64xf32>
    %155 = vector.extract_strided_slice %142 {offsets = [0, 128], sizes = [8, 64], strides = [1, 1]} : vector<8x256xf32> to vector<8x64xf32>
    %156 = math.tanh %155 : vector<8x64xf32>
    %157 = vector.extract_strided_slice %142 {offsets = [0, 192], sizes = [8, 64], strides = [1, 1]} : vector<8x256xf32> to vector<8x64xf32>
    %158 = arith.negf %157 : vector<8x64xf32>
    %159 = math.exp %158 : vector<8x64xf32>
    %cst_59 = arith.constant 1.000000e+00 : f32
    %160 = vector.broadcast %cst_59 : f32 to vector<8x64xf32>
    %161 = arith.addf %160, %159 : vector<8x64xf32>
    %162 = arith.divf %160, %161 : vector<8x64xf32>
    %163 = arith.mulf %154, %104 : vector<8x64xf32>
    %164 = arith.mulf %148, %156 : vector<8x64xf32>
    %165 = arith.addf %163, %164 : vector<8x64xf32>
    %166 = math.tanh %165 : vector<8x64xf32>
    %167 = arith.mulf %162, %166 : vector<8x64xf32>
    %168 = arith.truncf %167 : vector<8x64xf32> to vector<8x64xbf16>
    %c0_60 = arith.constant 0 : index
    %c0_61 = arith.constant 0 : index
    %169 = vector.load %arg17[%c0_60, %c0_61] : memref<8x128xbf16, #tpu.memory_space<vmem>>, vector<8x64xbf16>
    tpu.vector_store %arg17[%c0_60, %c0_61], %168 {strides = array<i32>} : memref<8x128xbf16, #tpu.memory_space<vmem>>, vector<8x64xbf16>,
    %c0_62 = arith.constant 0 : index
    %c0_63 = arith.constant 0 : index
    %170 = vector.load %arg17[%c0_62, %c0_63] : memref<8x128xbf16, #tpu.memory_space<vmem>>, vector<8x128xbf16>
    %cst_64 = arith.constant dense<0.000000e+00> : vector<8x256xf32>
    %171 = tpu.matmul %170, %9, %cst_64 {dimension_numbers = #tpu.dot_dimension_numbers<[1], [0], [0], [1], [0, 0, 1, 1], [], []>} : vector<8x128xbf16>, vector<128x256xbf16>, vector<8x256xf32> -> vector<8x256xf32>
    %172 = arith.addf %171, %12 : vector<8x256xf32>
    %173 = vector.extract_strided_slice %172 {offsets = [0, 0], sizes = [8, 64], strides = [1, 1]} : vector<8x256xf32> to vector<8x64xf32>
    %174 = arith.negf %173 : vector<8x64xf32>
    %175 = math.exp %174 : vector<8x64xf32>
    %cst_65 = arith.constant 1.000000e+00 : f32
    %176 = vector.broadcast %cst_65 : f32 to vector<8x64xf32>
    %177 = arith.addf %176, %175 : vector<8x64xf32>
    %178 = arith.divf %176, %177 : vector<8x64xf32>
    %179 = vector.extract_strided_slice %172 {offsets = [0, 64], sizes = [8, 64], strides = [1, 1]} : vector<8x256xf32> to vector<8x64xf32>
    %180 = arith.negf %179 : vector<8x64xf32>
    %181 = math.exp %180 : vector<8x64xf32>
    %cst_66 = arith.constant 1.000000e+00 : f32
    %182 = vector.broadcast %cst_66 : f32 to vector<8x64xf32>
    %183 = arith.addf %182, %181 : vector<8x64xf32>
    %184 = arith.divf %182, %183 : vector<8x64xf32>
    %185 = vector.extract_strided_slice %172 {offsets = [0, 128], sizes = [8, 64], strides = [1, 1]} : vector<8x256xf32> to vector<8x64xf32>
    %186 = math.tanh %185 : vector<8x64xf32>
    %187 = vector.extract_strided_slice %172 {offsets = [0, 192], sizes = [8, 64], strides = [1, 1]} : vector<8x256xf32> to vector<8x64xf32>
    %188 = arith.negf %187 : vector<8x64xf32>
    %189 = math.exp %188 : vector<8x64xf32>
    %cst_67 = arith.constant 1.000000e+00 : f32
    %190 = vector.broadcast %cst_67 : f32 to vector<8x64xf32>
    %191 = arith.addf %190, %189 : vector<8x64xf32>
    %192 = arith.divf %190, %191 : vector<8x64xf32>
    %193 = arith.mulf %184, %134 : vector<8x64xf32>
    %194 = arith.mulf %178, %186 : vector<8x64xf32>
    %195 = arith.addf %193, %194 : vector<8x64xf32>
    %196 = math.tanh %195 : vector<8x64xf32>
    %197 = arith.mulf %192, %196 : vector<8x64xf32>
    %198 = arith.truncf %197 : vector<8x64xf32> to vector<8x64xbf16>
    %c0_68 = arith.constant 0 : index
    %c64_69 = arith.constant 64 : index
    %199 = vector.load %arg17[%c0_68, %c64_69] : memref<8x128xbf16, #tpu.memory_space<vmem>>, vector<8x64xbf16>
    tpu.vector_store %arg17[%c0_68, %c64_69], %198 {strides = array<i32>} : memref<8x128xbf16, #tpu.memory_space<vmem>>, vector<8x64xbf16>,
    %c24 = arith.constant 24 : index
    %c0_70 = arith.constant 0 : index
    %200 = vector.load %arg16[%c24, %c0_70] : memref<64x256xf32, #tpu.memory_space<vmem>>, vector<8x256xf32>
    %c0_71 = arith.constant 0 : index
    %c0_72 = arith.constant 0 : index
    %201 = vector.load %arg17[%c0_71, %c0_72] : memref<8x128xbf16, #tpu.memory_space<vmem>>, vector<8x64xbf16>
    %cst_73 = arith.constant dense<0.000000e+00> : vector<8x256xf32>
    %202 = tpu.matmul %201, %8, %cst_73 {dimension_numbers = #tpu.dot_dimension_numbers<[1], [0], [0], [1], [0, 0, 1, 1], [], []>} : vector<8x64xbf16>, vector<64x256xbf16>, vector<8x256xf32> -> vector<8x256xf32>
    %203 = arith.addf %200, %202 : vector<8x256xf32>
    %204 = vector.extract_strided_slice %203 {offsets = [0, 0], sizes = [8, 64], strides = [1, 1]} : vector<8x256xf32> to vector<8x64xf32>
    %205 = arith.negf %204 : vector<8x64xf32>
    %206 = math.exp %205 : vector<8x64xf32>
    %cst_74 = arith.constant 1.000000e+00 : f32
    %207 = vector.broadcast %cst_74 : f32 to vector<8x64xf32>
    %208 = arith.addf %207, %206 : vector<8x64xf32>
    %209 = arith.divf %207, %208 : vector<8x64xf32>
    %210 = vector.extract_strided_slice %203 {offsets = [0, 64], sizes = [8, 64], strides = [1, 1]} : vector<8x256xf32> to vector<8x64xf32>
    %211 = arith.negf %210 : vector<8x64xf32>
    %212 = math.exp %211 : vector<8x64xf32>
    %cst_75 = arith.constant 1.000000e+00 : f32
    %213 = vector.broadcast %cst_75 : f32 to vector<8x64xf32>
    %214 = arith.addf %213, %212 : vector<8x64xf32>
    %215 = arith.divf %213, %214 : vector<8x64xf32>
    %216 = vector.extract_strided_slice %203 {offsets = [0, 128], sizes = [8, 64], strides = [1, 1]} : vector<8x256xf32> to vector<8x64xf32>
    %217 = math.tanh %216 : vector<8x64xf32>
    %218 = vector.extract_strided_slice %203 {offsets = [0, 192], sizes = [8, 64], strides = [1, 1]} : vector<8x256xf32> to vector<8x64xf32>
    %219 = arith.negf %218 : vector<8x64xf32>
    %220 = math.exp %219 : vector<8x64xf32>
    %cst_76 = arith.constant 1.000000e+00 : f32
    %221 = vector.broadcast %cst_76 : f32 to vector<8x64xf32>
    %222 = arith.addf %221, %220 : vector<8x64xf32>
    %223 = arith.divf %221, %222 : vector<8x64xf32>
    %224 = arith.mulf %215, %165 : vector<8x64xf32>
    %225 = arith.mulf %209, %217 : vector<8x64xf32>
    %226 = arith.addf %224, %225 : vector<8x64xf32>
    %227 = math.tanh %226 : vector<8x64xf32>
    %228 = arith.mulf %223, %227 : vector<8x64xf32>
    %229 = arith.truncf %228 : vector<8x64xf32> to vector<8x64xbf16>
    %c0_77 = arith.constant 0 : index
    %c0_78 = arith.constant 0 : index
    %230 = vector.load %arg17[%c0_77, %c0_78] : memref<8x128xbf16, #tpu.memory_space<vmem>>, vector<8x64xbf16>
    tpu.vector_store %arg17[%c0_77, %c0_78], %229 {strides = array<i32>} : memref<8x128xbf16, #tpu.memory_space<vmem>>, vector<8x64xbf16>,
    %c0_79 = arith.constant 0 : index
    %c0_80 = arith.constant 0 : index
    %231 = vector.load %arg17[%c0_79, %c0_80] : memref<8x128xbf16, #tpu.memory_space<vmem>>, vector<8x128xbf16>
    %cst_81 = arith.constant dense<0.000000e+00> : vector<8x256xf32>
    %232 = tpu.matmul %231, %9, %cst_81 {dimension_numbers = #tpu.dot_dimension_numbers<[1], [0], [0], [1], [0, 0, 1, 1], [], []>} : vector<8x128xbf16>, vector<128x256xbf16>, vector<8x256xf32> -> vector<8x256xf32>
    %233 = arith.addf %232, %12 : vector<8x256xf32>
    %234 = vector.extract_strided_slice %233 {offsets = [0, 0], sizes = [8, 64], strides = [1, 1]} : vector<8x256xf32> to vector<8x64xf32>
    %235 = arith.negf %234 : vector<8x64xf32>
    %236 = math.exp %235 : vector<8x64xf32>
    %cst_82 = arith.constant 1.000000e+00 : f32
    %237 = vector.broadcast %cst_82 : f32 to vector<8x64xf32>
    %238 = arith.addf %237, %236 : vector<8x64xf32>
    %239 = arith.divf %237, %238 : vector<8x64xf32>
    %240 = vector.extract_strided_slice %233 {offsets = [0, 64], sizes = [8, 64], strides = [1, 1]} : vector<8x256xf32> to vector<8x64xf32>
    %241 = arith.negf %240 : vector<8x64xf32>
    %242 = math.exp %241 : vector<8x64xf32>
    %cst_83 = arith.constant 1.000000e+00 : f32
    %243 = vector.broadcast %cst_83 : f32 to vector<8x64xf32>
    %244 = arith.addf %243, %242 : vector<8x64xf32>
    %245 = arith.divf %243, %244 : vector<8x64xf32>
    %246 = vector.extract_strided_slice %233 {offsets = [0, 128], sizes = [8, 64], strides = [1, 1]} : vector<8x256xf32> to vector<8x64xf32>
    %247 = math.tanh %246 : vector<8x64xf32>
    %248 = vector.extract_strided_slice %233 {offsets = [0, 192], sizes = [8, 64], strides = [1, 1]} : vector<8x256xf32> to vector<8x64xf32>
    %249 = arith.negf %248 : vector<8x64xf32>
    %250 = math.exp %249 : vector<8x64xf32>
    %cst_84 = arith.constant 1.000000e+00 : f32
    %251 = vector.broadcast %cst_84 : f32 to vector<8x64xf32>
    %252 = arith.addf %251, %250 : vector<8x64xf32>
    %253 = arith.divf %251, %252 : vector<8x64xf32>
    %254 = arith.mulf %245, %195 : vector<8x64xf32>
    %255 = arith.mulf %239, %247 : vector<8x64xf32>
    %256 = arith.addf %254, %255 : vector<8x64xf32>
    %257 = math.tanh %256 : vector<8x64xf32>
    %258 = arith.mulf %253, %257 : vector<8x64xf32>
    %259 = arith.truncf %258 : vector<8x64xf32> to vector<8x64xbf16>
    %c0_85 = arith.constant 0 : index
    %c64_86 = arith.constant 64 : index
    %260 = vector.load %arg17[%c0_85, %c64_86] : memref<8x128xbf16, #tpu.memory_space<vmem>>, vector<8x64xbf16>
    tpu.vector_store %arg17[%c0_85, %c64_86], %259 {strides = array<i32>} : memref<8x128xbf16, #tpu.memory_space<vmem>>, vector<8x64xbf16>,
    %c32 = arith.constant 32 : index
    %c0_87 = arith.constant 0 : index
    %261 = vector.load %arg16[%c32, %c0_87] : memref<64x256xf32, #tpu.memory_space<vmem>>, vector<8x256xf32>
    %c0_88 = arith.constant 0 : index
    %c0_89 = arith.constant 0 : index
    %262 = vector.load %arg17[%c0_88, %c0_89] : memref<8x128xbf16, #tpu.memory_space<vmem>>, vector<8x64xbf16>
    %cst_90 = arith.constant dense<0.000000e+00> : vector<8x256xf32>
    %263 = tpu.matmul %262, %8, %cst_90 {dimension_numbers = #tpu.dot_dimension_numbers<[1], [0], [0], [1], [0, 0, 1, 1], [], []>} : vector<8x64xbf16>, vector<64x256xbf16>, vector<8x256xf32> -> vector<8x256xf32>
    %264 = arith.addf %261, %263 : vector<8x256xf32>
    %265 = vector.extract_strided_slice %264 {offsets = [0, 0], sizes = [8, 64], strides = [1, 1]} : vector<8x256xf32> to vector<8x64xf32>
    %266 = arith.negf %265 : vector<8x64xf32>
    %267 = math.exp %266 : vector<8x64xf32>
    %cst_91 = arith.constant 1.000000e+00 : f32
    %268 = vector.broadcast %cst_91 : f32 to vector<8x64xf32>
    %269 = arith.addf %268, %267 : vector<8x64xf32>
    %270 = arith.divf %268, %269 : vector<8x64xf32>
    %271 = vector.extract_strided_slice %264 {offsets = [0, 64], sizes = [8, 64], strides = [1, 1]} : vector<8x256xf32> to vector<8x64xf32>
    %272 = arith.negf %271 : vector<8x64xf32>
    %273 = math.exp %272 : vector<8x64xf32>
    %cst_92 = arith.constant 1.000000e+00 : f32
    %274 = vector.broadcast %cst_92 : f32 to vector<8x64xf32>
    %275 = arith.addf %274, %273 : vector<8x64xf32>
    %276 = arith.divf %274, %275 : vector<8x64xf32>
    %277 = vector.extract_strided_slice %264 {offsets = [0, 128], sizes = [8, 64], strides = [1, 1]} : vector<8x256xf32> to vector<8x64xf32>
    %278 = math.tanh %277 : vector<8x64xf32>
    %279 = vector.extract_strided_slice %264 {offsets = [0, 192], sizes = [8, 64], strides = [1, 1]} : vector<8x256xf32> to vector<8x64xf32>
    %280 = arith.negf %279 : vector<8x64xf32>
    %281 = math.exp %280 : vector<8x64xf32>
    %cst_93 = arith.constant 1.000000e+00 : f32
    %282 = vector.broadcast %cst_93 : f32 to vector<8x64xf32>
    %283 = arith.addf %282, %281 : vector<8x64xf32>
    %284 = arith.divf %282, %283 : vector<8x64xf32>
    %285 = arith.mulf %276, %226 : vector<8x64xf32>
    %286 = arith.mulf %270, %278 : vector<8x64xf32>
    %287 = arith.addf %285, %286 : vector<8x64xf32>
    %288 = math.tanh %287 : vector<8x64xf32>
    %289 = arith.mulf %284, %288 : vector<8x64xf32>
    %290 = arith.truncf %289 : vector<8x64xf32> to vector<8x64xbf16>
    %c0_94 = arith.constant 0 : index
    %c0_95 = arith.constant 0 : index
    %291 = vector.load %arg17[%c0_94, %c0_95] : memref<8x128xbf16, #tpu.memory_space<vmem>>, vector<8x64xbf16>
    tpu.vector_store %arg17[%c0_94, %c0_95], %290 {strides = array<i32>} : memref<8x128xbf16, #tpu.memory_space<vmem>>, vector<8x64xbf16>,
    %c0_96 = arith.constant 0 : index
    %c0_97 = arith.constant 0 : index
    %292 = vector.load %arg17[%c0_96, %c0_97] : memref<8x128xbf16, #tpu.memory_space<vmem>>, vector<8x128xbf16>
    %cst_98 = arith.constant dense<0.000000e+00> : vector<8x256xf32>
    %293 = tpu.matmul %292, %9, %cst_98 {dimension_numbers = #tpu.dot_dimension_numbers<[1], [0], [0], [1], [0, 0, 1, 1], [], []>} : vector<8x128xbf16>, vector<128x256xbf16>, vector<8x256xf32> -> vector<8x256xf32>
    %294 = arith.addf %293, %12 : vector<8x256xf32>
    %295 = vector.extract_strided_slice %294 {offsets = [0, 0], sizes = [8, 64], strides = [1, 1]} : vector<8x256xf32> to vector<8x64xf32>
    %296 = arith.negf %295 : vector<8x64xf32>
    %297 = math.exp %296 : vector<8x64xf32>
    %cst_99 = arith.constant 1.000000e+00 : f32
    %298 = vector.broadcast %cst_99 : f32 to vector<8x64xf32>
    %299 = arith.addf %298, %297 : vector<8x64xf32>
    %300 = arith.divf %298, %299 : vector<8x64xf32>
    %301 = vector.extract_strided_slice %294 {offsets = [0, 64], sizes = [8, 64], strides = [1, 1]} : vector<8x256xf32> to vector<8x64xf32>
    %302 = arith.negf %301 : vector<8x64xf32>
    %303 = math.exp %302 : vector<8x64xf32>
    %cst_100 = arith.constant 1.000000e+00 : f32
    %304 = vector.broadcast %cst_100 : f32 to vector<8x64xf32>
    %305 = arith.addf %304, %303 : vector<8x64xf32>
    %306 = arith.divf %304, %305 : vector<8x64xf32>
    %307 = vector.extract_strided_slice %294 {offsets = [0, 128], sizes = [8, 64], strides = [1, 1]} : vector<8x256xf32> to vector<8x64xf32>
    %308 = math.tanh %307 : vector<8x64xf32>
    %309 = vector.extract_strided_slice %294 {offsets = [0, 192], sizes = [8, 64], strides = [1, 1]} : vector<8x256xf32> to vector<8x64xf32>
    %310 = arith.negf %309 : vector<8x64xf32>
    %311 = math.exp %310 : vector<8x64xf32>
    %cst_101 = arith.constant 1.000000e+00 : f32
    %312 = vector.broadcast %cst_101 : f32 to vector<8x64xf32>
    %313 = arith.addf %312, %311 : vector<8x64xf32>
    %314 = arith.divf %312, %313 : vector<8x64xf32>
    %315 = arith.mulf %306, %256 : vector<8x64xf32>
    %316 = arith.mulf %300, %308 : vector<8x64xf32>
    %317 = arith.addf %315, %316 : vector<8x64xf32>
    %318 = math.tanh %317 : vector<8x64xf32>
    %319 = arith.mulf %314, %318 : vector<8x64xf32>
    %320 = arith.truncf %319 : vector<8x64xf32> to vector<8x64xbf16>
    %c0_102 = arith.constant 0 : index
    %c64_103 = arith.constant 64 : index
    %321 = vector.load %arg17[%c0_102, %c64_103] : memref<8x128xbf16, #tpu.memory_space<vmem>>, vector<8x64xbf16>
    tpu.vector_store %arg17[%c0_102, %c64_103], %320 {strides = array<i32>} : memref<8x128xbf16, #tpu.memory_space<vmem>>, vector<8x64xbf16>,
    %c40 = arith.constant 40 : index
    %c0_104 = arith.constant 0 : index
    %322 = vector.load %arg16[%c40, %c0_104] : memref<64x256xf32, #tpu.memory_space<vmem>>, vector<8x256xf32>
    %c0_105 = arith.constant 0 : index
    %c0_106 = arith.constant 0 : index
    %323 = vector.load %arg17[%c0_105, %c0_106] : memref<8x128xbf16, #tpu.memory_space<vmem>>, vector<8x64xbf16>
    %cst_107 = arith.constant dense<0.000000e+00> : vector<8x256xf32>
    %324 = tpu.matmul %323, %8, %cst_107 {dimension_numbers = #tpu.dot_dimension_numbers<[1], [0], [0], [1], [0, 0, 1, 1], [], []>} : vector<8x64xbf16>, vector<64x256xbf16>, vector<8x256xf32> -> vector<8x256xf32>
    %325 = arith.addf %322, %324 : vector<8x256xf32>
    %326 = vector.extract_strided_slice %325 {offsets = [0, 0], sizes = [8, 64], strides = [1, 1]} : vector<8x256xf32> to vector<8x64xf32>
    %327 = arith.negf %326 : vector<8x64xf32>
    %328 = math.exp %327 : vector<8x64xf32>
    %cst_108 = arith.constant 1.000000e+00 : f32
    %329 = vector.broadcast %cst_108 : f32 to vector<8x64xf32>
    %330 = arith.addf %329, %328 : vector<8x64xf32>
    %331 = arith.divf %329, %330 : vector<8x64xf32>
    %332 = vector.extract_strided_slice %325 {offsets = [0, 64], sizes = [8, 64], strides = [1, 1]} : vector<8x256xf32> to vector<8x64xf32>
    %333 = arith.negf %332 : vector<8x64xf32>
    %334 = math.exp %333 : vector<8x64xf32>
    %cst_109 = arith.constant 1.000000e+00 : f32
    %335 = vector.broadcast %cst_109 : f32 to vector<8x64xf32>
    %336 = arith.addf %335, %334 : vector<8x64xf32>
    %337 = arith.divf %335, %336 : vector<8x64xf32>
    %338 = vector.extract_strided_slice %325 {offsets = [0, 128], sizes = [8, 64], strides = [1, 1]} : vector<8x256xf32> to vector<8x64xf32>
    %339 = math.tanh %338 : vector<8x64xf32>
    %340 = vector.extract_strided_slice %325 {offsets = [0, 192], sizes = [8, 64], strides = [1, 1]} : vector<8x256xf32> to vector<8x64xf32>
    %341 = arith.negf %340 : vector<8x64xf32>
    %342 = math.exp %341 : vector<8x64xf32>
    %cst_110 = arith.constant 1.000000e+00 : f32
    %343 = vector.broadcast %cst_110 : f32 to vector<8x64xf32>
    %344 = arith.addf %343, %342 : vector<8x64xf32>
    %345 = arith.divf %343, %344 : vector<8x64xf32>
    %346 = arith.mulf %337, %287 : vector<8x64xf32>
    %347 = arith.mulf %331, %339 : vector<8x64xf32>
    %348 = arith.addf %346, %347 : vector<8x64xf32>
    %349 = math.tanh %348 : vector<8x64xf32>
    %350 = arith.mulf %345, %349 : vector<8x64xf32>
    %351 = arith.truncf %350 : vector<8x64xf32> to vector<8x64xbf16>
    %c0_111 = arith.constant 0 : index
    %c0_112 = arith.constant 0 : index
    %352 = vector.load %arg17[%c0_111, %c0_112] : memref<8x128xbf16, #tpu.memory_space<vmem>>, vector<8x64xbf16>
    tpu.vector_store %arg17[%c0_111, %c0_112], %351 {strides = array<i32>} : memref<8x128xbf16, #tpu.memory_space<vmem>>, vector<8x64xbf16>,
    %c0_113 = arith.constant 0 : index
    %c0_114 = arith.constant 0 : index
    %353 = vector.load %arg17[%c0_113, %c0_114] : memref<8x128xbf16, #tpu.memory_space<vmem>>, vector<8x128xbf16>
    %cst_115 = arith.constant dense<0.000000e+00> : vector<8x256xf32>
    %354 = tpu.matmul %353, %9, %cst_115 {dimension_numbers = #tpu.dot_dimension_numbers<[1], [0], [0], [1], [0, 0, 1, 1], [], []>} : vector<8x128xbf16>, vector<128x256xbf16>, vector<8x256xf32> -> vector<8x256xf32>
    %355 = arith.addf %354, %12 : vector<8x256xf32>
    %356 = vector.extract_strided_slice %355 {offsets = [0, 0], sizes = [8, 64], strides = [1, 1]} : vector<8x256xf32> to vector<8x64xf32>
    %357 = arith.negf %356 : vector<8x64xf32>
    %358 = math.exp %357 : vector<8x64xf32>
    %cst_116 = arith.constant 1.000000e+00 : f32
    %359 = vector.broadcast %cst_116 : f32 to vector<8x64xf32>
    %360 = arith.addf %359, %358 : vector<8x64xf32>
    %361 = arith.divf %359, %360 : vector<8x64xf32>
    %362 = vector.extract_strided_slice %355 {offsets = [0, 64], sizes = [8, 64], strides = [1, 1]} : vector<8x256xf32> to vector<8x64xf32>
    %363 = arith.negf %362 : vector<8x64xf32>
    %364 = math.exp %363 : vector<8x64xf32>
    %cst_117 = arith.constant 1.000000e+00 : f32
    %365 = vector.broadcast %cst_117 : f32 to vector<8x64xf32>
    %366 = arith.addf %365, %364 : vector<8x64xf32>
    %367 = arith.divf %365, %366 : vector<8x64xf32>
    %368 = vector.extract_strided_slice %355 {offsets = [0, 128], sizes = [8, 64], strides = [1, 1]} : vector<8x256xf32> to vector<8x64xf32>
    %369 = math.tanh %368 : vector<8x64xf32>
    %370 = vector.extract_strided_slice %355 {offsets = [0, 192], sizes = [8, 64], strides = [1, 1]} : vector<8x256xf32> to vector<8x64xf32>
    %371 = arith.negf %370 : vector<8x64xf32>
    %372 = math.exp %371 : vector<8x64xf32>
    %cst_118 = arith.constant 1.000000e+00 : f32
    %373 = vector.broadcast %cst_118 : f32 to vector<8x64xf32>
    %374 = arith.addf %373, %372 : vector<8x64xf32>
    %375 = arith.divf %373, %374 : vector<8x64xf32>
    %376 = arith.mulf %367, %317 : vector<8x64xf32>
    %377 = arith.mulf %361, %369 : vector<8x64xf32>
    %378 = arith.addf %376, %377 : vector<8x64xf32>
    %379 = math.tanh %378 : vector<8x64xf32>
    %380 = arith.mulf %375, %379 : vector<8x64xf32>
    %381 = arith.truncf %380 : vector<8x64xf32> to vector<8x64xbf16>
    %c0_119 = arith.constant 0 : index
    %c64_120 = arith.constant 64 : index
    %382 = vector.load %arg17[%c0_119, %c64_120] : memref<8x128xbf16, #tpu.memory_space<vmem>>, vector<8x64xbf16>
    tpu.vector_store %arg17[%c0_119, %c64_120], %381 {strides = array<i32>} : memref<8x128xbf16, #tpu.memory_space<vmem>>, vector<8x64xbf16>,
    %c48 = arith.constant 48 : index
    %c0_121 = arith.constant 0 : index
    %383 = vector.load %arg16[%c48, %c0_121] : memref<64x256xf32, #tpu.memory_space<vmem>>, vector<8x256xf32>
    %c0_122 = arith.constant 0 : index
    %c0_123 = arith.constant 0 : index
    %384 = vector.load %arg17[%c0_122, %c0_123] : memref<8x128xbf16, #tpu.memory_space<vmem>>, vector<8x64xbf16>
    %cst_124 = arith.constant dense<0.000000e+00> : vector<8x256xf32>
    %385 = tpu.matmul %384, %8, %cst_124 {dimension_numbers = #tpu.dot_dimension_numbers<[1], [0], [0], [1], [0, 0, 1, 1], [], []>} : vector<8x64xbf16>, vector<64x256xbf16>, vector<8x256xf32> -> vector<8x256xf32>
    %386 = arith.addf %383, %385 : vector<8x256xf32>
    %387 = vector.extract_strided_slice %386 {offsets = [0, 0], sizes = [8, 64], strides = [1, 1]} : vector<8x256xf32> to vector<8x64xf32>
    %388 = arith.negf %387 : vector<8x64xf32>
    %389 = math.exp %388 : vector<8x64xf32>
    %cst_125 = arith.constant 1.000000e+00 : f32
    %390 = vector.broadcast %cst_125 : f32 to vector<8x64xf32>
    %391 = arith.addf %390, %389 : vector<8x64xf32>
    %392 = arith.divf %390, %391 : vector<8x64xf32>
    %393 = vector.extract_strided_slice %386 {offsets = [0, 64], sizes = [8, 64], strides = [1, 1]} : vector<8x256xf32> to vector<8x64xf32>
    %394 = arith.negf %393 : vector<8x64xf32>
    %395 = math.exp %394 : vector<8x64xf32>
    %cst_126 = arith.constant 1.000000e+00 : f32
    %396 = vector.broadcast %cst_126 : f32 to vector<8x64xf32>
    %397 = arith.addf %396, %395 : vector<8x64xf32>
    %398 = arith.divf %396, %397 : vector<8x64xf32>
    %399 = vector.extract_strided_slice %386 {offsets = [0, 128], sizes = [8, 64], strides = [1, 1]} : vector<8x256xf32> to vector<8x64xf32>
    %400 = math.tanh %399 : vector<8x64xf32>
    %401 = vector.extract_strided_slice %386 {offsets = [0, 192], sizes = [8, 64], strides = [1, 1]} : vector<8x256xf32> to vector<8x64xf32>
    %402 = arith.negf %401 : vector<8x64xf32>
    %403 = math.exp %402 : vector<8x64xf32>
    %cst_127 = arith.constant 1.000000e+00 : f32
    %404 = vector.broadcast %cst_127 : f32 to vector<8x64xf32>
    %405 = arith.addf %404, %403 : vector<8x64xf32>
    %406 = arith.divf %404, %405 : vector<8x64xf32>
    %407 = arith.mulf %398, %348 : vector<8x64xf32>
    %408 = arith.mulf %392, %400 : vector<8x64xf32>
    %409 = arith.addf %407, %408 : vector<8x64xf32>
    %410 = math.tanh %409 : vector<8x64xf32>
    %411 = arith.mulf %406, %410 : vector<8x64xf32>
    %412 = arith.truncf %411 : vector<8x64xf32> to vector<8x64xbf16>
    %c0_128 = arith.constant 0 : index
    %c0_129 = arith.constant 0 : index
    %413 = vector.load %arg17[%c0_128, %c0_129] : memref<8x128xbf16, #tpu.memory_space<vmem>>, vector<8x64xbf16>
    tpu.vector_store %arg17[%c0_128, %c0_129], %412 {strides = array<i32>} : memref<8x128xbf16, #tpu.memory_space<vmem>>, vector<8x64xbf16>,
    %c0_130 = arith.constant 0 : index
    %c0_131 = arith.constant 0 : index
    %414 = vector.load %arg17[%c0_130, %c0_131] : memref<8x128xbf16, #tpu.memory_space<vmem>>, vector<8x128xbf16>
    %cst_132 = arith.constant dense<0.000000e+00> : vector<8x256xf32>
    %415 = tpu.matmul %414, %9, %cst_132 {dimension_numbers = #tpu.dot_dimension_numbers<[1], [0], [0], [1], [0, 0, 1, 1], [], []>} : vector<8x128xbf16>, vector<128x256xbf16>, vector<8x256xf32> -> vector<8x256xf32>
    %416 = arith.addf %415, %12 : vector<8x256xf32>
    %417 = vector.extract_strided_slice %416 {offsets = [0, 0], sizes = [8, 64], strides = [1, 1]} : vector<8x256xf32> to vector<8x64xf32>
    %418 = arith.negf %417 : vector<8x64xf32>
    %419 = math.exp %418 : vector<8x64xf32>
    %cst_133 = arith.constant 1.000000e+00 : f32
    %420 = vector.broadcast %cst_133 : f32 to vector<8x64xf32>
    %421 = arith.addf %420, %419 : vector<8x64xf32>
    %422 = arith.divf %420, %421 : vector<8x64xf32>
    %423 = vector.extract_strided_slice %416 {offsets = [0, 64], sizes = [8, 64], strides = [1, 1]} : vector<8x256xf32> to vector<8x64xf32>
    %424 = arith.negf %423 : vector<8x64xf32>
    %425 = math.exp %424 : vector<8x64xf32>
    %cst_134 = arith.constant 1.000000e+00 : f32
    %426 = vector.broadcast %cst_134 : f32 to vector<8x64xf32>
    %427 = arith.addf %426, %425 : vector<8x64xf32>
    %428 = arith.divf %426, %427 : vector<8x64xf32>
    %429 = vector.extract_strided_slice %416 {offsets = [0, 128], sizes = [8, 64], strides = [1, 1]} : vector<8x256xf32> to vector<8x64xf32>
    %430 = math.tanh %429 : vector<8x64xf32>
    %431 = vector.extract_strided_slice %416 {offsets = [0, 192], sizes = [8, 64], strides = [1, 1]} : vector<8x256xf32> to vector<8x64xf32>
    %432 = arith.negf %431 : vector<8x64xf32>
    %433 = math.exp %432 : vector<8x64xf32>
    %cst_135 = arith.constant 1.000000e+00 : f32
    %434 = vector.broadcast %cst_135 : f32 to vector<8x64xf32>
    %435 = arith.addf %434, %433 : vector<8x64xf32>
    %436 = arith.divf %434, %435 : vector<8x64xf32>
    %437 = arith.mulf %428, %378 : vector<8x64xf32>
    %438 = arith.mulf %422, %430 : vector<8x64xf32>
    %439 = arith.addf %437, %438 : vector<8x64xf32>
    %440 = math.tanh %439 : vector<8x64xf32>
    %441 = arith.mulf %436, %440 : vector<8x64xf32>
    %442 = arith.truncf %441 : vector<8x64xf32> to vector<8x64xbf16>
    %c0_136 = arith.constant 0 : index
    %c64_137 = arith.constant 64 : index
    %443 = vector.load %arg17[%c0_136, %c64_137] : memref<8x128xbf16, #tpu.memory_space<vmem>>, vector<8x64xbf16>
    tpu.vector_store %arg17[%c0_136, %c64_137], %442 {strides = array<i32>} : memref<8x128xbf16, #tpu.memory_space<vmem>>, vector<8x64xbf16>,
    %c56 = arith.constant 56 : index
    %c0_138 = arith.constant 0 : index
    %444 = vector.load %arg16[%c56, %c0_138] : memref<64x256xf32, #tpu.memory_space<vmem>>, vector<8x256xf32>
    %c0_139 = arith.constant 0 : index
    %c0_140 = arith.constant 0 : index
    %445 = vector.load %arg17[%c0_139, %c0_140] : memref<8x128xbf16, #tpu.memory_space<vmem>>, vector<8x64xbf16>
    %cst_141 = arith.constant dense<0.000000e+00> : vector<8x256xf32>
    %446 = tpu.matmul %445, %8, %cst_141 {dimension_numbers = #tpu.dot_dimension_numbers<[1], [0], [0], [1], [0, 0, 1, 1], [], []>} : vector<8x64xbf16>, vector<64x256xbf16>, vector<8x256xf32> -> vector<8x256xf32>
    %447 = arith.addf %444, %446 : vector<8x256xf32>
    %448 = vector.extract_strided_slice %447 {offsets = [0, 0], sizes = [8, 64], strides = [1, 1]} : vector<8x256xf32> to vector<8x64xf32>
    %449 = arith.negf %448 : vector<8x64xf32>
    %450 = math.exp %449 : vector<8x64xf32>
    %cst_142 = arith.constant 1.000000e+00 : f32
    %451 = vector.broadcast %cst_142 : f32 to vector<8x64xf32>
    %452 = arith.addf %451, %450 : vector<8x64xf32>
    %453 = arith.divf %451, %452 : vector<8x64xf32>
    %454 = vector.extract_strided_slice %447 {offsets = [0, 64], sizes = [8, 64], strides = [1, 1]} : vector<8x256xf32> to vector<8x64xf32>
    %455 = arith.negf %454 : vector<8x64xf32>
    %456 = math.exp %455 : vector<8x64xf32>
    %cst_143 = arith.constant 1.000000e+00 : f32
    %457 = vector.broadcast %cst_143 : f32 to vector<8x64xf32>
    %458 = arith.addf %457, %456 : vector<8x64xf32>
    %459 = arith.divf %457, %458 : vector<8x64xf32>
    %460 = vector.extract_strided_slice %447 {offsets = [0, 128], sizes = [8, 64], strides = [1, 1]} : vector<8x256xf32> to vector<8x64xf32>
    %461 = math.tanh %460 : vector<8x64xf32>
    %462 = vector.extract_strided_slice %447 {offsets = [0, 192], sizes = [8, 64], strides = [1, 1]} : vector<8x256xf32> to vector<8x64xf32>
    %463 = arith.negf %462 : vector<8x64xf32>
    %464 = math.exp %463 : vector<8x64xf32>
    %cst_144 = arith.constant 1.000000e+00 : f32
    %465 = vector.broadcast %cst_144 : f32 to vector<8x64xf32>
    %466 = arith.addf %465, %464 : vector<8x64xf32>
    %467 = arith.divf %465, %466 : vector<8x64xf32>
    %468 = arith.mulf %459, %409 : vector<8x64xf32>
    %469 = arith.mulf %453, %461 : vector<8x64xf32>
    %470 = arith.addf %468, %469 : vector<8x64xf32>
    %471 = math.tanh %470 : vector<8x64xf32>
    %472 = arith.mulf %467, %471 : vector<8x64xf32>
    %473 = arith.truncf %472 : vector<8x64xf32> to vector<8x64xbf16>
    %c0_145 = arith.constant 0 : index
    %c0_146 = arith.constant 0 : index
    %474 = vector.load %arg17[%c0_145, %c0_146] : memref<8x128xbf16, #tpu.memory_space<vmem>>, vector<8x64xbf16>
    tpu.vector_store %arg17[%c0_145, %c0_146], %473 {strides = array<i32>} : memref<8x128xbf16, #tpu.memory_space<vmem>>, vector<8x64xbf16>,
    %c0_147 = arith.constant 0 : index
    %c0_148 = arith.constant 0 : index
    %475 = vector.load %arg17[%c0_147, %c0_148] : memref<8x128xbf16, #tpu.memory_space<vmem>>, vector<8x128xbf16>
    %cst_149 = arith.constant dense<0.000000e+00> : vector<8x256xf32>
    %476 = tpu.matmul %475, %9, %cst_149 {dimension_numbers = #tpu.dot_dimension_numbers<[1], [0], [0], [1], [0, 0, 1, 1], [], []>} : vector<8x128xbf16>, vector<128x256xbf16>, vector<8x256xf32> -> vector<8x256xf32>
    %477 = arith.addf %476, %12 : vector<8x256xf32>
    %478 = vector.extract_strided_slice %477 {offsets = [0, 0], sizes = [8, 64], strides = [1, 1]} : vector<8x256xf32> to vector<8x64xf32>
    %479 = arith.negf %478 : vector<8x64xf32>
    %480 = math.exp %479 : vector<8x64xf32>
    %cst_150 = arith.constant 1.000000e+00 : f32
    %481 = vector.broadcast %cst_150 : f32 to vector<8x64xf32>
    %482 = arith.addf %481, %480 : vector<8x64xf32>
    %483 = arith.divf %481, %482 : vector<8x64xf32>
    %484 = vector.extract_strided_slice %477 {offsets = [0, 64], sizes = [8, 64], strides = [1, 1]} : vector<8x256xf32> to vector<8x64xf32>
    %485 = arith.negf %484 : vector<8x64xf32>
    %486 = math.exp %485 : vector<8x64xf32>
    %cst_151 = arith.constant 1.000000e+00 : f32
    %487 = vector.broadcast %cst_151 : f32 to vector<8x64xf32>
    %488 = arith.addf %487, %486 : vector<8x64xf32>
    %489 = arith.divf %487, %488 : vector<8x64xf32>
    %490 = vector.extract_strided_slice %477 {offsets = [0, 128], sizes = [8, 64], strides = [1, 1]} : vector<8x256xf32> to vector<8x64xf32>
    %491 = math.tanh %490 : vector<8x64xf32>
    %492 = vector.extract_strided_slice %477 {offsets = [0, 192], sizes = [8, 64], strides = [1, 1]} : vector<8x256xf32> to vector<8x64xf32>
    %493 = arith.negf %492 : vector<8x64xf32>
    %494 = math.exp %493 : vector<8x64xf32>
    %cst_152 = arith.constant 1.000000e+00 : f32
    %495 = vector.broadcast %cst_152 : f32 to vector<8x64xf32>
    %496 = arith.addf %495, %494 : vector<8x64xf32>
    %497 = arith.divf %495, %496 : vector<8x64xf32>
    %498 = arith.mulf %489, %439 : vector<8x64xf32>
    %499 = arith.mulf %483, %491 : vector<8x64xf32>
    %500 = arith.addf %498, %499 : vector<8x64xf32>
    %501 = math.tanh %500 : vector<8x64xf32>
    %502 = arith.mulf %497, %501 : vector<8x64xf32>
    %503 = arith.truncf %502 : vector<8x64xf32> to vector<8x64xbf16>
    %c0_153 = arith.constant 0 : index
    %c64_154 = arith.constant 64 : index
    %504 = vector.load %arg17[%c0_153, %c64_154] : memref<8x128xbf16, #tpu.memory_space<vmem>>, vector<8x64xbf16>
    tpu.vector_store %arg17[%c0_153, %c64_154], %503 {strides = array<i32>} : memref<8x128xbf16, #tpu.memory_space<vmem>>, vector<8x64xbf16>,
    %c0_155 = arith.constant 0 : index
    %c0_156 = arith.constant 0 : index
    %505 = vector.load %arg2[%c0_155, %c0_156] : memref<8x16xbf16, #tpu.memory_space<vmem>>, vector<8x16xbf16>
    %c0_157 = arith.constant 0 : index
    %c0_158 = arith.constant 0 : index
    %506 = vector.load %arg8[%c0_157, %c0_158] : memref<16x32xbf16, #tpu.memory_space<vmem>>, vector<16x32xbf16>
    %cst_159 = arith.constant dense<0.000000e+00> : vector<8x32xf32>
    %507 = tpu.matmul %505, %506, %cst_159 {dimension_numbers = #tpu.dot_dimension_numbers<[1], [0], [0], [1], [0, 0, 1, 1], [], []>} : vector<8x16xbf16>, vector<16x32xbf16>, vector<8x32xf32> -> vector<8x32xf32>
    %c0_160 = arith.constant 0 : index
    %c0_161 = arith.constant 0 : index
    %508 = vector.load %arg9[%c0_160, %c0_161] : memref<1x32xf32, #tpu.memory_space<vmem>>, vector<1x32xf32>
    %509 = vector.broadcast %508 : vector<1x32xf32> to vector<8x32xf32>
    %510 = arith.addf %507, %509 : vector<8x32xf32>
    %cst_162 = arith.constant 0.000000e+00 : f32
    %511 = vector.broadcast %cst_162 : f32 to vector<8x32xf32>
    %512 = arith.maximumf %510, %511 : vector<8x32xf32>
    %c0_163 = arith.constant 0 : index
    %c64_164 = arith.constant 64 : index
    %513 = vector.load %arg17[%c0_163, %c64_164] : memref<8x128xbf16, #tpu.memory_space<vmem>>, vector<8x64xbf16>
    %c0_165 = arith.constant 0 : index
    %c0_166 = arith.constant 0 : index
    %514 = vector.load %arg10[%c0_165, %c0_166] : memref<64x64xbf16, #tpu.memory_space<vmem>>, vector<64x64xbf16>
    %cst_167 = arith.constant dense<0.000000e+00> : vector<8x64xf32>
    %515 = tpu.matmul %513, %514, %cst_167 {dimension_numbers = #tpu.dot_dimension_numbers<[1], [0], [0], [1], [0, 0, 1, 1], [], []>} : vector<8x64xbf16>, vector<64x64xbf16>, vector<8x64xf32> -> vector<8x64xf32>
    %516 = arith.truncf %512 : vector<8x32xf32> to vector<8x32xbf16>
    %c0_168 = arith.constant 0 : index
    %c0_169 = arith.constant 0 : index
    %517 = vector.load %arg11[%c0_168, %c0_169] : memref<32x64xbf16, #tpu.memory_space<vmem>>, vector<32x64xbf16>
    %cst_170 = arith.constant dense<0.000000e+00> : vector<8x64xf32>
    %518 = tpu.matmul %516, %517, %cst_170 {dimension_numbers = #tpu.dot_dimension_numbers<[1], [0], [0], [1], [0, 0, 1, 1], [], []>} : vector<8x32xbf16>, vector<32x64xbf16>, vector<8x64xf32> -> vector<8x64xf32>
    %519 = arith.addf %515, %518 : vector<8x64xf32>
    %c0_171 = arith.constant 0 : index
    %c0_172 = arith.constant 0 : index
    %520 = vector.load %arg12[%c0_171, %c0_172] : memref<1x64xf32, #tpu.memory_space<vmem>>, vector<1x64xf32>
    %521 = vector.broadcast %520 : vector<1x64xf32> to vector<8x64xf32>
    %522 = arith.addf %519, %521 : vector<8x64xf32>
    %cst_173 = arith.constant 0.000000e+00 : f32
    %523 = vector.broadcast %cst_173 : f32 to vector<8x64xf32>
    %524 = arith.maximumf %522, %523 : vector<8x64xf32>
    %525 = arith.truncf %524 : vector<8x64xf32> to vector<8x64xbf16>
    %c0_174 = arith.constant 0 : index
    %c0_175 = arith.constant 0 : index
    %526 = vector.load %arg13[%c0_174, %c0_175] : memref<64x128xbf16, #tpu.memory_space<vmem>>, vector<64x128xbf16>
    %cst_176 = arith.constant dense<0.000000e+00> : vector<8x128xf32>
    %527 = tpu.matmul %525, %526, %cst_176 {dimension_numbers = #tpu.dot_dimension_numbers<[1], [0], [0], [1], [0, 0, 1, 1], [], []>} : vector<8x64xbf16>, vector<64x128xbf16>, vector<8x128xf32> -> vector<8x128xf32>
    %c0_177 = arith.constant 0 : index
    %c0_178 = arith.constant 0 : index
    %528 = vector.load %arg14[%c0_177, %c0_178] : memref<1x128xf32, #tpu.memory_space<vmem>>, vector<1x128xf32>
    %529 = vector.broadcast %528 : vector<1x128xf32> to vector<8x128xf32>
    %530 = arith.addf %527, %529 : vector<8x128xf32>
    %c0_179 = arith.constant 0 : index
    %c0_180 = arith.constant 0 : index
    %531 = vector.load %arg15[%c0_179, %c0_180] : memref<8x128xf32, #tpu.memory_space<vmem>>, vector<8x128xf32>
    tpu.vector_store %arg15[%c0_179, %c0_180], %530 {strides = array<i32>} : memref<8x128xf32, #tpu.memory_space<vmem>>, vector<8x128xf32>,
    return
  }
  func.func @transform_0(%arg0: i32) -> (i32, i32, i32) {
    %c0_i32 = arith.constant 0 : i32
    %c0_i32_0 = arith.constant 0 : i32
    %c0_i32_1 = arith.constant 0 : i32
    return %arg0, %c0_i32, %c0_i32_0 : i32, i32, i32
  }
  func.func @transform_1(%arg0: i32) -> (i32, i32) {
    %c0_i32 = arith.constant 0 : i32
    %c0_i32_0 = arith.constant 0 : i32
    return %arg0, %c0_i32 : i32, i32
  }
  func.func @transform_2(%arg0: i32) -> (i32, i32) {
    %c0_i32 = arith.constant 0 : i32
    %c0_i32_0 = arith.constant 0 : i32
    %c0_i32_1 = arith.constant 0 : i32
    return %c0_i32, %c0_i32_0 : i32, i32
  }
  func.func @transform_3(%arg0: i32) -> (i32, i32) {
    %c0_i32 = arith.constant 0 : i32
    %c0_i32_0 = arith.constant 0 : i32
    %c0_i32_1 = arith.constant 0 : i32
    return %c0_i32, %c0_i32_0 : i32, i32
  }
  func.func @transform_4(%arg0: i32) -> (i32, i32) {
    %c0_i32 = arith.constant 0 : i32
    %c0_i32_0 = arith.constant 0 : i32
    %c0_i32_1 = arith.constant 0 : i32
    return %c0_i32, %c0_i32_0 : i32, i32
  }
  func.func @transform_5(%arg0: i32) -> (i32, i32) {
    %c0_i32 = arith.constant 0 : i32
    %c0_i32_0 = arith.constant 0 : i32
    %c0_i32_1 = arith.constant 0 : i32
    return %c0_i32, %c0_i32_0 : i32, i32
  }
  func.func @transform_6(%arg0: i32) -> (i32, i32) {
    %c0_i32 = arith.constant 0 : i32
    %c0_i32_0 = arith.constant 0 : i32
    %c0_i32_1 = arith.constant 0 : i32
    return %c0_i32, %c0_i32_0 : i32, i32
  }
  func.func @transform_7(%arg0: i32) -> (i32, i32) {
    %c0_i32 = arith.constant 0 : i32
    %c0_i32_0 = arith.constant 0 : i32
    %c0_i32_1 = arith.constant 0 : i32
    return %c0_i32, %c0_i32_0 : i32, i32
  }
  func.func @transform_8(%arg0: i32) -> (i32, i32) {
    %c0_i32 = arith.constant 0 : i32
    %c0_i32_0 = arith.constant 0 : i32
    %c0_i32_1 = arith.constant 0 : i32
    return %c0_i32, %c0_i32_0 : i32, i32
  }
  func.func @transform_9(%arg0: i32) -> (i32, i32) {
    %c0_i32 = arith.constant 0 : i32
    %c0_i32_0 = arith.constant 0 : i32
    %c0_i32_1 = arith.constant 0 : i32
    return %c0_i32, %c0_i32_0 : i32, i32
  }
  func.func @transform_10(%arg0: i32) -> (i32, i32) {
    %c0_i32 = arith.constant 0 : i32
    %c0_i32_0 = arith.constant 0 : i32
    %c0_i32_1 = arith.constant 0 : i32
    return %c0_i32, %c0_i32_0 : i32, i32
  }
  func.func @transform_11(%arg0: i32) -> (i32, i32) {
    %c0_i32 = arith.constant 0 : i32
    %c0_i32_0 = arith.constant 0 : i32
    %c0_i32_1 = arith.constant 0 : i32
    return %c0_i32, %c0_i32_0 : i32, i32
  }
  func.func @transform_12(%arg0: i32) -> (i32, i32) {
    %c0_i32 = arith.constant 0 : i32
    %c0_i32_0 = arith.constant 0 : i32
    %c0_i32_1 = arith.constant 0 : i32
    return %c0_i32, %c0_i32_0 : i32, i32
  }
  func.func @transform_13(%arg0: i32) -> (i32, i32) {
    %c0_i32 = arith.constant 0 : i32
    %c0_i32_0 = arith.constant 0 : i32
    %c0_i32_1 = arith.constant 0 : i32
    return %c0_i32, %c0_i32_0 : i32, i32
  }
  func.func @transform_14(%arg0: i32) -> (i32, i32) {
    %c0_i32 = arith.constant 0 : i32
    %c0_i32_0 = arith.constant 0 : i32
    return %arg0, %c0_i32 : i32, i32
  }
}

</mosaic_0001>

<bundles_post_ra>
// kernel: tpu_custom_call.1
= control target key start
LH: loop header
LB: loop body
LE: loop exit
PB: predicated region body
PF: predicated region fallthrough
CT: control target
= control target key end

     0   :  { %19 = vsyncpa [#allocation5], 0  ;;  %s3337_s0 = inlined_call_operand.vmem [shape: bf16[1,64,16], index: 0, kind: input, shape index: {}]   ;;  %s3338_s1 = inlined_call_operand.hbm [shape: bf16[8,16], index: 1, kind: input, shape index: {}]   ;;  %s3339_s2 = inlined_call_operand.hbm [shape: bf16[16,256], index: 2, kind: input, shape index: {}]   ;;  %s3340_s3 = inlined_call_operand.hbm [shape: bf16[64,256], index: 3, kind: input, shape index: {}]   ;;  %s3341_s4 = inlined_call_operand.vmem [shape: f32[1,256], index: 4, kind: input, shape index: {}]   ;;  %s3342_s5 = inlined_call_operand.hbm [shape: bf16[128,256], index: 5, kind: input, shape index: {}]   ;;  %s3343_s6 = inlined_call_operand.hbm [shape: f32[1,256], index: 6, kind: input, shape index: {}]   ;;  %s3344_s7 = inlined_call_operand.hbm [shape: bf16[16,32], index: 7, kind: input, shape index: {}]   ;;  %s3345_s8 = inlined_call_operand.vmem [shape: f32[1,32], index: 8, kind: input, shape index: {}]   ;;  %s3346_s9 = inlined_call_operand.vmem [shape: bf16[64,64], index: 9, kind: input, shape index: {}]   ;;  %s3347_s10 = inlined_call_operand.hbm [shape: bf16[32,64], index: 10, kind: input, shape index: {}]   ;;  %s3348_s11 = inlined_call_operand.vmem [shape: f32[1,64], index: 11, kind: input, shape index: {}]   ;;  %s3349_s12 = inlined_call_operand.vmem [shape: bf16[64,128], index: 12, kind: input, shape index: {}]   ;;  %s3350_s13 = inlined_call_operand.vmem [shape: f32[1,128], index: 13, kind: input, shape index: {}]   ;;  %s3351_s14 = inlined_call_operand.hbm [shape: f32[8,128], index: 14, kind: output, shape index: {}]  }
   0x1   :  { %20 = vsyncpa [#allocation8], 0 }
   0x2   :  { %21 = vsyncpa [#allocation11], 0 }
   0x3   :  { %22 = vsyncpa [#allocation14], 0 }
   0x4   :  { %23 = vsyncpa [#allocation6], 0  ;;  %s2559_s29 = smov [#allocation7]   ;;  %s2373_s17 = scalar_lea.hbm %s3339_s2, 256 }
   0x5   :  { %s41_s30 = sshll.u32 %s2559_s29, 4  ;;  %p2374_p0 = scmp.ne.s32.totalorder %s3339_s2, %s2373_s17  ;;  %s42_s30 = int_to_ptr.vmem [resolvable:$true] %s41_s30 }
   0x6   :  { %p2377_p1 = scmp.lt.u32.totalorder %s2373_s17, %s3339_s2 }
   0x8   :  { %p2379_p2 = pnand %p2377_p1, %p2374_p0 }
   0xa   :  { %2382 = shalt.err (!%p2379_p2)
}
   0xb   :  { %s2383_s22 = scalar_lea.vmem %s42_s30, 256  ;;  %p2388_p4 = scmp.lt.s32.totalorder %s42_s30, %s42_s30 }
   0xc   :  { %p2384_p3 = scmp.ne.s32.totalorder %s42_s30, %s2383_s22  ;;  %p2389_p5 = scmp.lt.s32.totalorder %s2383_s22, %s2383_s22 }
   0xe   :  { %p2390_p6 = por %p2389_p5, %p2388_p4 }
  0x10   :  { %p2391_p7 = pnand %p2390_p6, %p2384_p3 }
  0x12   :  { %2394 = shalt.err (!%p2391_p7)
}
  0x13   :  { %s2560_s23 = smov 128   ;;  %s2561_s24 = smov 8  }
  0x14   :  { %47 = dma.hbm_to_vmem [thread:$0]  %s3339_s2, 256, %s42_s30, [#allocation8], %s2560_s23, %s2560_s23, %s2561_s24  }
  0x15   :  { %s2562_s27 = smov [#allocation10]   ;;  %s2563_s29 = smov [#allocation13]  }
  0x16   :  { %s67_s28 = sshll.u32 %s2562_s27, 4  ;;  %s89_s15 = sshll.u32 %s2563_s29, 4  ;;  %s68_s28 = int_to_ptr.vmem [resolvable:$true] %s67_s28  ;;  %s90_s15 = int_to_ptr.vmem [resolvable:$true] %s89_s15 }
  0x17   :  { %s2395_s18 = scalar_lea.hbm %s3342_s5, 2048 }
  0x18   :  { %p2396_p8 = scmp.ne.s32.totalorder %s3342_s5, %s2395_s18  ;;  %p2399_p9 = scmp.lt.u32.totalorder %s2395_s18, %s3342_s5 }
  0x1a   :  { %p2401_p10 = pnand %p2399_p9, %p2396_p8 }
  0x1c   :  { %2404 = shalt.err (!%p2401_p10)
}
  0x1d   :  { %s2405_s2 = scalar_lea.vmem %s68_s28, 2048  ;;  %p2410_p12 = scmp.lt.s32.totalorder %s68_s28, %s68_s28 }
  0x1e   :  { %p2406_p11 = scmp.ne.s32.totalorder %s68_s28, %s2405_s2  ;;  %p2411_p13 = scmp.lt.s32.totalorder %s2405_s2, %s2405_s2 }
  0x20   :  { %p2412_p0 = por %p2411_p13, %p2410_p12 }
  0x22   :  { %p2413_p1 = pnand %p2412_p0, %p2406_p11 }
  0x24   :  { %2416 = shalt.err (!%p2413_p1)
}
  0x25   :  { %73 = dma.hbm_to_vmem [thread:$0]  %s3342_s5, 2048, %s68_s28, [#allocation11], %s2560_s23, %s2560_s23, %s2561_s24  }
  0x26   :  { %s2417_s29 = scalar_lea.hbm %s3344_s7, 128 }
  0x27   :  { %p2418_p2 = scmp.ne.s32.totalorder %s3344_s7, %s2417_s29  ;;  %p2421_p3 = scmp.lt.u32.totalorder %s2417_s29, %s3344_s7 }
  0x29   :  { %p2423_p4 = pnand %p2421_p3, %p2418_p2 }
  0x2b   :  { %2426 = shalt.err (!%p2423_p4)
}
  0x2c   :  { %s2427_s20 = scalar_lea.vmem %s90_s15, 128  ;;  %p2432_p6 = scmp.lt.s32.totalorder %s90_s15, %s90_s15 }
  0x2d   :  { %p2428_p5 = scmp.ne.s32.totalorder %s90_s15, %s2427_s20  ;;  %p2433_p7 = scmp.lt.s32.totalorder %s2427_s20, %s2427_s20 }
  0x2f   :  { %p2434_p8 = por %p2433_p7, %p2432_p6 }
  0x31   :  { %p2435_p9 = pnand %p2434_p8, %p2428_p5 }
  0x33   :  { %2438 = shalt.err (!%p2435_p9)
}
  0x34   :  { %s2564_s5 = smov 64   ;;  %s2565_s28 = smov 4  }
  0x35   :  { %95 = dma.hbm_to_vmem [thread:$0]  %s3344_s7, 128, %s90_s15, [#allocation14], %s2564_s5, %s2564_s5, %s2565_s28  }
  0x36   :  { %s2566_s2 = smov [#allocation4]   ;;  %s2567_s25 = smov [#allocation9]  }
  0x37   :  { %s32_s30 = sshll.u32 %s2566_s2, 4  ;;  %s53_s26 = sshll.u32 %s2567_s25, 4  ;;  %s33_s30 = int_to_ptr.vmem [resolvable:$true] %s32_s30  ;;  %s54_s26 = int_to_ptr.vmem [resolvable:$true] %s53_s26 }
  0x38   :  { %s2439_s16 = scalar_lea.hbm %s3338_s1, 64 }
  0x39   :  { %p2440_p10 = scmp.ne.s32.totalorder %s3338_s1, %s2439_s16  ;;  %p2443_p11 = scmp.lt.u32.totalorder %s2439_s16, %s3338_s1 }
  0x3b   :  { %p2445_p12 = pnand %p2443_p11, %p2440_p10 }
  0x3d   :  { %2448 = shalt.err (!%p2445_p12)
}
  0x3e   :  { %s2449_s7 = scalar_lea.vmem %s33_s30, 64  ;;  %p2454_p0 = scmp.lt.s32.totalorder %s33_s30, %s33_s30 }
  0x3f   :  { %p2450_p13 = scmp.ne.s32.totalorder %s33_s30, %s2449_s7  ;;  %p2455_p1 = scmp.lt.s32.totalorder %s2449_s7, %s2449_s7 }
  0x41   :  { %p2456_p2 = por %p2455_p1, %p2454_p0 }
  0x43   :  { %p2457_p3 = pnand %p2456_p2, %p2450_p13 }
  0x45   :  { %2460 = shalt.err (!%p2457_p3)
}
  0x46   :  { %35 = dma.hbm_to_vmem [thread:$0]  %s3338_s1, 64, %s33_s30, [#allocation5]  }
  0x47   :  { %s2461_s25 = scalar_lea.hbm %s3340_s3, 1024 }
  0x48   :  { %p2462_p4 = scmp.ne.s32.totalorder %s3340_s3, %s2461_s25  ;;  %p2465_p5 = scmp.lt.u32.totalorder %s2461_s25, %s3340_s3 }
  0x4a   :  { %p2467_p6 = pnand %p2465_p5, %p2462_p4 }
  0x4c   :  { %2470 = shalt.err (!%p2467_p6)
}
  0x4d   :  { %s2471_s18 = scalar_lea.vmem %s54_s26, 1024  ;;  %p2476_p8 = scmp.lt.s32.totalorder %s54_s26, %s54_s26 }
  0x4e   :  { %p2472_p7 = scmp.ne.s32.totalorder %s54_s26, %s2471_s18  ;;  %p2477_p9 = scmp.lt.s32.totalorder %s2471_s18, %s2471_s18 }
  0x50   :  { %p2478_p10 = por %p2477_p9, %p2476_p8 }
  0x52   :  { %p2479_p11 = pnand %p2478_p10, %p2472_p7 }
  0x54   :  { %2482 = shalt.err (!%p2479_p11)
}
  0x55   :  { %59 = dma.hbm_to_vmem [thread:$0]  %s3340_s3, 1024, %s54_s26, [#allocation8], %s2560_s23, %s2560_s23, %s2561_s24  }
  0x56   :  { %s2568_s19 = smov [#allocation12]   ;;  %s2569_s7 = smov [#allocation15]  }
  0x57   :  { %s80_s20 = sshll.u32 %s2568_s19, 4  ;;  %s105_s15 = sshll.u32 %s2569_s7, 4  ;;  %s81_s20 = int_to_ptr.vmem [resolvable:$true] %s80_s20  ;;  %s106_s15 = int_to_ptr.vmem [resolvable:$true] %s105_s15 }
  0x58   :  { %s2483_s2 = scalar_lea.hbm %s3343_s6, 32 }
  0x59   :  { %p2484_p12 = scmp.ne.s32.totalorder %s3343_s6, %s2483_s2  ;;  %p2487_p13 = scmp.lt.u32.totalorder %s2483_s2, %s3343_s6 }
  0x5b   :  { %p2489_p0 = pnand %p2487_p13, %p2484_p12 }
  0x5d   :  { %2492 = shalt.err (!%p2489_p0)
}
  0x5e   :  { %s2493_s3 = scalar_lea.vmem %s81_s20, 32  ;;  %p2498_p2 = scmp.lt.s32.totalorder %s81_s20, %s81_s20 }
  0x5f   :  { %p2494_p1 = scmp.ne.s32.totalorder %s81_s20, %s2493_s3  ;;  %p2499_p3 = scmp.lt.s32.totalorder %s2493_s3, %s2493_s3 }
  0x61   :  { %p2500_p4 = por %p2499_p3, %p2498_p2 }
  0x63   :  { %p2501_p5 = pnand %p2500_p4, %p2494_p1 }
  0x65   :  { %2504 = shalt.err (!%p2501_p5)
}
  0x66   :  { %83 = dma.hbm_to_vmem [thread:$0]  %s3343_s6, 32, %s81_s20, [#allocation11]  }
  0x67   :  { %s2505_s18 = scalar_lea.hbm %s3347_s10, 256 }
  0x68   :  { %p2506_p6 = scmp.ne.s32.totalorder %s3347_s10, %s2505_s18  ;;  %p2509_p7 = scmp.lt.u32.totalorder %s2505_s18, %s3347_s10 }
  0x6a   :  { %p2511_p8 = pnand %p2509_p7, %p2506_p6 }
  0x6c   :  { %2514 = shalt.err (!%p2511_p8)
}
  0x6d   :  { %s2515_s21 = scalar_lea.vmem %s106_s15, 256  ;;  %p2520_p10 = scmp.lt.s32.totalorder %s106_s15, %s106_s15 }
  0x6e   :  { %p2516_p9 = scmp.ne.s32.totalorder %s106_s15, %s2515_s21  ;;  %p2521_p11 = scmp.lt.s32.totalorder %s2515_s21, %s2515_s21 }
  0x70   :  { %p2522_p12 = por %p2521_p11, %p2520_p10 }
  0x72   :  { %p2523_p13 = pnand %p2522_p12, %p2516_p9 }
  0x74   :  { %2526 = shalt.err (!%p2523_p13)
}
  0x75   :  { %111 = dma.hbm_to_vmem [thread:$0]  %s3347_s10, 256, %s106_s15, [#allocation14], %s2564_s5, %s2564_s5, %s2565_s28  }
  0x76   :  { %2549 = dma.done.wait [#allocation5], 64  }
  0x77   :  { %2550 = vsyncadd [#allocation5], 4294967232 }
  0x78   :  { %2551 = dma.done.wait [#allocation8], 1280  }
  0x79   :  { %2552 = vsyncadd [#allocation8], 4294966016 }
  0x7a   :  { %2553 = dma.done.wait [#allocation11], 2080  }
  0x7b   :  { %2554 = vsyncadd [#allocation11], 4294965216 }
  0x7c   :  { %2555 = dma.done.wait [#allocation14], 384  }
  0x7d   :  { %2556 = vsyncadd [#allocation14], 4294966912  ;;  %v2570_v0 = vmov 0   ;;  %v2751_v1 = vld [vmem:[#allocation9 + $0x4] ss:$8 sps:$4 sm:$0xff]   ;;  %vm192_vm0 = vcmask 130048   ;;  %v152_v13 = vlaneseq }
  0x7e   :  { %237 = vmatprep.mubr.bf16.mxu0 %v2570_v0  ;;  %330 = vst [vmem:[#allocation3] sm:$0xf] %v2570_v0  ;;  %410 = vmatprep.mubr.bf16.mxu1 %v2570_v0  ;;  %v2753_v2 = vld [vmem:[#allocation9] ss:$8 sps:$4 sm:$0xff]   ;;  %v2756_v3 = vld [vmem:[#allocation9 + $0x14] ss:$8 sps:$4 sm:$0xff]  }
  0x7f   :  { %378 = vmatprep.subr.bf16.mxu1 %v2751_v1  ;;  %v2758_v4 = vld [vmem:[#allocation9 + $0x10] ss:$8 sps:$4 sm:$0xff]   ;;  %v2110_v5 = vld [vmem:[#allocation7 + $0x4] ss:$8 sps:$4 sm:$0xff]   ;;  %v2762_v7 = vld [vmem:[#allocation9 + $0x24] ss:$8 sps:$4 sm:$0xff]  }
  0x80   :  { %379 = vmatpush1.bf16.msra.mxu1 %v2753_v2  ;;  %v2112_v6 = vld [vmem:[#allocation7] ss:$8 sps:$4 sm:$0xff]   ;;  %205 = vmatprep.subr.bf16.mxu0 %v2110_v5  ;;  %v2116_v8 = vld [vmem:[%s3337_s0] sm:$0xff]   ;;  %v2771_v10 = vld [vmem:[#allocation9 + $0x34] ss:$8 sps:$4 sm:$0xff]   ;;  %vm374_vm1 = vcmask 523264  }
  0x81   :  { %380 = vmatprep.subr.bf16.mxu1 %v2756_v3  ;;  %206 = vmatpush1.bf16.msra.mxu0 %v2112_v6  ;;  %v2768_v9 = vld [vmem:[#allocation9 + $0x20] ss:$8 sps:$4 sm:$0xff]   ;;  %v2774_v11 = vld [vmem:[#allocation9 + $0x30] ss:$8 sps:$4 sm:$0xff]   ;;  %v2790_v14 = vshrl.u32 %v152_v13, 7  ;;  %vm450_vm2 = vcmask 519168  }
  0x82   :  { %v150_v16 = vld [vmem:[%s3341_s4] sm:$0x3]  ;;  %v2812_v38 = vld [vmem:[#allocation10 + $0x4] ss:$8 sps:$4 sm:$0xff]   ;;  %v2816_v40 = vld [vmem:[#allocation10 + $0x14] ss:$8 sps:$4 sm:$0xff]  }
  0x83   :  { %v154_v15 = vsub.s32 0, %v2790_v14  ;;  %v158_v17 = vsub.s32 1, %v2790_v14  ;;  %v2814_v39 = vld [vmem:[#allocation10] ss:$8 sps:$4 sm:$0xff]   ;;  %v2126_v41 = vld [vmem:[%s3337_s0 + $0x8] sm:$0xff]   ;;  %533 = vmatprep.subr.bf16.mxu0 %v2812_v38  ;;  %v2133_v46 = vld [vmem:[%s3337_s0 + $0x10] sm:$0xff]  }
  0x84   :  { %381 = vmatpush1.bf16.msra.mxu1 %v2758_v4  ;;  %1933 = vmatmul.mubr.msk.bf16.vlgmr.msra.gmra.mrb[0].mxu0 %vm192_vm0, %v2116_v8  ;;  %v2824_v42 = vld [vmem:[#allocation10 + $0x10] ss:$8 sps:$4 sm:$0xff]   ;;  %v2828_v43 = vld [vmem:[#allocation10 + $0x24] ss:$8 sps:$4 sm:$0xff]   ;;  %v2832_v44 = vld [vmem:[#allocation10 + $0x20] ss:$8 sps:$4 sm:$0xff]  }
  0x85   :  { %382 = vmatprep.subr.bf16.mxu1 %v2762_v7  ;;  %247 = vmatprep.mubr.bf16.mxu0 %v2570_v0  ;;  %v333_v12 = vld [vmem:[#allocation3] sm:$0xf]  ;;  %v2799_v20 = vrot.slane %v150_v16, %v154_v15  ;;  %v2805_v22 = vrot.slane %v150_v16, %v158_v17  ;;  %v2835_v45 = vld [vmem:[#allocation10 + $0x34] ss:$8 sps:$4 sm:$0xff]   ;;  %v2841_v47 = vld [vmem:[#allocation10 + $0x30] ss:$8 sps:$4 sm:$0xff]  }
  0x86   :  { %534 = vmatpush1.bf16.msra.mxu0 %v2814_v39  ;;  %v2845_v48 = vld [vmem:[#allocation10 + $0x44] ss:$8 sps:$4 sm:$0xff]   ;;  %v2849_v49 = vld [vmem:[#allocation10 + $0x40] ss:$8 sps:$4 sm:$0xff]   ;;  %v2852_v50 = vld [vmem:[#allocation10 + $0x54] ss:$8 sps:$4 sm:$0xff]  }
  0x87   :  { %535 = vmatprep.subr.bf16.mxu0 %v2816_v40  ;;  %v2140_v51 = vld [vmem:[%s3337_s0 + $0x18] sm:$0xff]   ;;  %v2858_v52 = vld [vmem:[#allocation10 + $0x50] ss:$8 sps:$4 sm:$0xff]   ;;  %v315_v61 = vld [vmem:[#allocation10 + $0x68] sm:$0xff]  ;;  %vm597_vm3 = vcmask 1043968   ;;  %vm2572_vm4 = vmmov 0  }
  0x88   :  { %383 = vmatpush1.bf16.msra.mxu1 %v2768_v9  ;;  %v2862_v53 = vld [vmem:[#allocation10 + $0x64] ss:$8 sps:$4 sm:$0xff]   ;;  %v2873_v63 = vld [vmem:[#allocation10 + $0x74] ss:$8 sps:$4 sm:$0xff]   ;;  %v2875_v5 = vld [vmem:[#allocation10 + $0x70] ss:$8 sps:$4 sm:$0xff]  }
  0x89   :  { %384 = vmatprep.subr.bf16.mxu1 %v2771_v10  ;;  %v314_v60 = vld [vmem:[#allocation10 + $0x60] sm:$0xff]  ;;  %vm1700_vm5 = vcmask 261120  }
  0x8a   :  { %536 = vmatpush1.bf16.msra.mxu0 %v2824_v42  ;;  %v2870_v62 = vcombine.low %v314_v60, %v315_v61 }
  0x8b   :  { %537 = vmatprep.subr.bf16.mxu0 %v2828_v43 }
  0x8c   :  { %385 = vmatpush1.bf16.msra.mxu1 %v2774_v11  ;;  %1934 = vmatmul.mubr.msk.bf16.gmra.mrb[4].mxu0 %vm192_vm0, %v2126_v41 }
  0x8d   :  { %605 = vmatprep.subr.bf16.mxu1 %v2751_v1  ;;  %257 = vmatprep.mubr.bf16.mxu0 %v2570_v0 }
  0x8e   :  { %538 = vmatpush1.bf16.msra.mxu0 %v2832_v44 }
  0x8f   :  { %1945 = vmatmul.mubr.msk.bf16.vlgmr.msra.gmra.mrb[0].mxu1 %vm374_vm1, %v333_v12  ;;  %539 = vmatprep.subr.bf16.mxu0 %v2835_v45 }
  0x90   :  { %606 = vmatpush1.bf16.msra.mxu1 %v2753_v2  ;;  %637 = vmatprep.mubr.bf16.mxu1 %v2570_v0 }
  0x91   :  { %607 = vmatprep.subr.bf16.mxu1 %v2756_v3 }
  0x92   :  { %540 = vmatpush1.bf16.msra.mxu0 %v2841_v47 }
  0x93   :  { %541 = vmatprep.subr.bf16.mxu0 %v2845_v48 }
  0x94   :  { %608 = vmatpush1.bf16.msra.mxu1 %v2758_v4  ;;  %1935 = vmatmul.mubr.msk.bf16.gmra.mrb[8].mxu0 %vm192_vm0, %v2133_v46 }
  0x95   :  { %609 = vmatprep.subr.bf16.mxu1 %v2762_v7  ;;  %267 = vmatprep.mubr.bf16.mxu0 %v2570_v0 }
  0x96   :  { %542 = vmatpush1.bf16.msra.mxu0 %v2849_v49 }
  0x97   :  { %543 = vmatprep.subr.bf16.mxu0 %v2852_v50 }
  0x98   :  { %610 = vmatpush1.bf16.msra.mxu1 %v2768_v9 }
  0x99   :  { %611 = vmatprep.subr.bf16.mxu1 %v2771_v10 }
  0x9a   :  { %544 = vmatpush1.bf16.msra.mxu0 %v2858_v52 }
  0x9b   :  { %545 = vmatprep.subr.bf16.mxu0 %v2862_v53 }
  0x9c   :  { %612 = vmatpush1.bf16.msra.mxu1 %v2774_v11  ;;  %1936 = vmatmul.mubr.msk.bf16.gmra.mrb[12].mxu0 %vm192_vm0, %v2140_v51 }
  0x9d   :  { %679 = vmatprep.subr.bf16.mxu1 %v2812_v38  ;;  %565 = vmatprep.mubr.bf16.mxu0 %v2570_v0 }
  0x9e   :  { %546 = vmatpush1.bf16.msra.mxu0 %v2870_v62 }
  0x9f   :  { %547 = vmatprep.subr.bf16.mxu0 %v2873_v63 }
  0xa2   :  { %548 = vmatpush1.bf16.msra.mxu0 %v2875_v5 }
  0xa3   :  { %750 = vmatprep.subr.bf16.mxu0 %v2751_v1 }
 0x157   :  { %v239_v18 = vpop.f32.mrb[0].mxu0 }
 0x158   :  { %v241_v19 = vpop.f32.mrb[1].mxu0  ;;  %v240_v24 = vadd.f32 %v239_v18, %v2799_v20 }
 0x159   :  { %v2801_v21 = vpop.f32.mrb[2].mxu0  ;;  %v242_v25 = vadd.f32 %v241_v19, %v2805_v22 }
 0x15a   :  { %v2807_v23 = vpop.f32.mrb[3].mxu0 }
 0x15f   :  { %v2881_v16 = vpop.f32.mrb[4].mxu0 }
 0x160   :  { %v2883_v18 = vpop.f32.mrb[5].mxu0 }
 0x161   :  { %v2885_v19 = vpop.f32.mrb[6].mxu0 }
 0x162   :  { %v412_v26 = vpop.f32.mrb[0].mxu1 }
 0x163   :  { %v419_v27 = vadd.f32 %v412_v26, %v240_v24  ;;  %v414_v28 = vpop.f32.mrb[1].mxu1  ;;  %v2887_v24 = vpop.f32.mrb[7].mxu0 }
 0x164   :  { %v420_v29 = vadd.f32 %v414_v28, %v242_v25  ;;  %v416_v30 = vpop.f32.mrb[2].mxu1 }
 0x165   :  { %v1946_v31 = vmul.f32 -1.442695, %v419_v27  ;;  %v417_v32 = vpop.f32.mrb[3].mxu1 }
 0x166   :  { %v1947_v54 = vmul.f32 -1.442695, %v420_v29 }
 0x167   :  { %2158 = vpow2.f32 %v1946_v31  ;;  %v2889_v25 = vpop.f32.mrb[8].mxu0 }
 0x168   :  { %2160 = vtanh.f32 %v420_v29  ;;  %v2891_v26 = vpop.f32.mrb[9].mxu0 }
 0x169   :  { %v2893_v27 = vpop.f32.mrb[10].mxu0 }
 0x16a   :  { %v2895_v28 = vpop.f32.mrb[11].mxu0 }
 0x16f   :  { %v2897_v29 = vpop.f32.mrb[12].mxu0 }
 0x170   :  { %v2899_v30 = vpop.f32.mrb[13].mxu0 }
 0x171   :  { %v2159_v33 = vpop.eup %2158  ;;  %v2901_v31 = vpop.f32.mrb[14].mxu0 }
 0x172   :  { %v424_v34 = vadd.f32 1.0, %v2159_v33  ;;  %v2161_v35 = vpop.eup %2160  ;;  %v2903_v32 = vpop.f32.mrb[15].mxu0 }
 0x174   :  { %2162 = vrcp.f32 %v424_v34 }
 0x175   :  { %2164 = vpow2.f32 %v1947_v54 }
 0x17e   :  { %v2163_v36 = vpop.eup %2162 }
 0x17f   :  { %v435_v37 = vmul.f32 %v2163_v36, %v2161_v35  ;;  %v2165_v55 = vpop.eup %2164  ;;  %v434_v57 = vmul.f32 0.0, %v2163_v36  ;;  %v318_v35 = vld [vmem:[#allocation12] sm:$0x3] }
 0x180   :  { %v431_v56 = vadd.f32 1.0, %v2165_v55  ;;  %v2917_v36 = vrot.slane %v318_v35, %v154_v15 }
 0x181   :  { %437 = vrot.lane.b32.xlu0 %v435_v37, %s2564_s5 }
 0x182   :  { %2166 = vrcp.f32 %v431_v56  ;;  %v2922_v56 = vrot.slane %v318_v35, %v158_v17 }
 0x18c   :  { %v2167_v6 = vpop.eup %2166 }
 0x1f3   :  { %v438_v58 = vpop.permute.xlu0 %437 }
 0x1f4   :  { %v2867_v59 = vadd.f32 %v438_v58, %v434_v57 }
 0x1f6   :  { %2168 = vtanh.f32 %v2867_v59 }
 0x200   :  { %v2169_v8 = vpop.eup %2168 }
 0x201   :  { %v442_v12 = vmul.f32 %v2169_v8, %v2167_v6 }
 0x203   :  { %v2028_v13 = vpack.c.bf16 %v442_v12, %v442_v12 }
 0x205   :  { %447 = vrot.lane.b32.xlu0 %v2028_v13, %s2564_s5 }
 0x277   :  { %v448_v33 = vpop.permute.xlu0 %447 }
 0x278   :  { %451 = vst.msk [vmem:[#allocation3] sm:$0xf] %vm450_vm2, %v448_v33 }
 0x27f   :  { %v452_v34 = vld [vmem:[#allocation3] sm:$0xf] }
 0x280   :  { %566 = vmatmul.mubr.bf16.vlgmr.msra.gmra.mrb[16].mxu0 %v452_v34 }
 0x281   :  { %751 = vmatpush1.bf16.msra.mxu0 %v2753_v2  ;;  %782 = vmatprep.mubr.bf16.mxu0 %v2570_v0 }
 0x282   :  { %752 = vmatprep.subr.bf16.mxu0 %v2756_v3 }
 0x285   :  { %753 = vmatpush1.bf16.msra.mxu0 %v2758_v4 }
 0x286   :  { %754 = vmatprep.subr.bf16.mxu0 %v2762_v7 }
 0x289   :  { %755 = vmatpush1.bf16.msra.mxu0 %v2768_v9 }
 0x28a   :  { %756 = vmatprep.subr.bf16.mxu0 %v2771_v10 }
 0x28d   :  { %757 = vmatpush1.bf16.msra.mxu0 %v2774_v11 }
 0x28e   :  { %824 = vmatprep.subr.bf16.mxu0 %v2812_v38 }
 0x353   :  { %v567_v37 = vpop.f32.mrb[16].mxu0 }
 0x354   :  { %v568_v41 = vadd.f32 %v567_v37, %v2917_v36  ;;  %v569_v46 = vpop.f32.mrb[17].mxu0 }
 0x355   :  { %v571_v51 = vpop.f32.mrb[18].mxu0  ;;  %v570_v57 = vadd.f32 %v569_v46, %v2922_v56 }
 0x356   :  { %v1965_v54 = vmul.f32 -1.442695, %v568_v41  ;;  %v572_v55 = vpop.f32.mrb[19].mxu0  ;;  %v244_v51 = vadd.f32 %v2801_v21, %v2799_v20 }
 0x357   :  { %v1966_v8 = vmul.f32 -1.442695, %v570_v57 }
 0x358   :  { %2170 = vpow2.f32 %v1965_v54  ;;  %v246_v54 = vadd.f32 %v2807_v23, %v2805_v22 }
 0x359   :  { %2172 = vtanh.f32 %v570_v57 }
 0x362   :  { %v2171_v58 = vpop.eup %2170 }
 0x363   :  { %v577_v60 = vadd.f32 1.0, %v2171_v58  ;;  %v2173_v15 = vpop.eup %2172 }
 0x365   :  { %2174 = vrcp.f32 %v577_v60 }
 0x366   :  { %2176 = vpow2.f32 %v1966_v8 }
 0x36f   :  { %v2175_v61 = vpop.eup %2174 }
 0x370   :  { %v588_v6 = vmul.f32 %v2175_v61, %v2173_v15  ;;  %v2177_v12 = vpop.eup %2176  ;;  %v587_v33 = vmul.f32 0.0, %v2175_v61 }
 0x371   :  { %v584_v13 = vadd.f32 1.0, %v2177_v12 }
 0x372   :  { %590 = vrot.lane.b32.xlu1 %v588_v6, %s2564_s5 }
 0x373   :  { %2178 = vrcp.f32 %v584_v13 }
 0x37d   :  { %v2179_v17 = vpop.eup %2178 }
 0x3e4   :  { %v591_v34 = vpop.permute.xlu1 %590 }
 0x3e5   :  { %v2926_v14 = vadd.f32 %v591_v34, %v587_v33 }
 0x3e7   :  { %2180 = vtanh.f32 %v2926_v14 }
 0x3f1   :  { %v2181_v35 = vpop.eup %2180 }
 0x3f2   :  { %v595_v37 = vmul.f32 %v2181_v35, %v2179_v17 }
 0x3f4   :  { %v596_v41 = vpack.c.bf16 %v595_v37, %v595_v37 }
 0x3f6   :  { %598 = vst.msk [vmem:[#allocation3] sm:$0xf] %vm597_vm3, %v596_v41 }
 0x3fd   :  { %v601_v46 = vld [vmem:[#allocation3] sm:$0xf] }
 0x3fe   :  { %1967 = vmatmul.mubr.msk.bf16.vlgmr.msra.gmra.mrb[4].mxu1 %vm374_vm1, %v601_v46 }
 0x3ff   :  { %680 = vmatpush1.bf16.msra.mxu1 %v2814_v39  ;;  %711 = vmatprep.mubr.bf16.mxu1 %v2570_v0 }
 0x400   :  { %681 = vmatprep.subr.bf16.mxu1 %v2816_v40 }
 0x403   :  { %682 = vmatpush1.bf16.msra.mxu1 %v2824_v42 }
 0x404   :  { %683 = vmatprep.subr.bf16.mxu1 %v2828_v43 }
 0x407   :  { %684 = vmatpush1.bf16.msra.mxu1 %v2832_v44 }
 0x408   :  { %685 = vmatprep.subr.bf16.mxu1 %v2835_v45 }
 0x40b   :  { %686 = vmatpush1.bf16.msra.mxu1 %v2841_v47 }
 0x40c   :  { %687 = vmatprep.subr.bf16.mxu1 %v2845_v48 }
 0x40f   :  { %688 = vmatpush1.bf16.msra.mxu1 %v2849_v49 }
 0x410   :  { %689 = vmatprep.subr.bf16.mxu1 %v2852_v50 }
 0x413   :  { %690 = vmatpush1.bf16.msra.mxu1 %v2858_v52 }
 0x414   :  { %691 = vmatprep.subr.bf16.mxu1 %v2862_v53 }
 0x417   :  { %692 = vmatpush1.bf16.msra.mxu1 %v2870_v62 }
 0x418   :  { %693 = vmatprep.subr.bf16.mxu1 %v2873_v63 }
 0x41b   :  { %694 = vmatpush1.bf16.msra.mxu1 %v2875_v5 }
 0x41c   :  { %895 = vmatprep.subr.bf16.mxu1 %v2751_v1 }
 0x4d1   :  { %v639_v55 = vpop.f32.mrb[4].mxu1 }
 0x4d2   :  { %v646_v57 = vadd.f32 %v639_v55, %v244_v51  ;;  %v641_v58 = vpop.f32.mrb[5].mxu1 }
 0x4d3   :  { %v647_v60 = vadd.f32 %v641_v58, %v246_v54  ;;  %v643_v15 = vpop.f32.mrb[6].mxu1 }
 0x4d4   :  { %v1968_v61 = vmul.f32 -1.442695, %v646_v57  ;;  %v644_v6 = vpop.f32.mrb[7].mxu1 }
 0x4d5   :  { %v1969_v21 = vmul.f32 -1.442695, %v647_v60 }
 0x4d6   :  { %2182 = vpow2.f32 %v1968_v61 }
 0x4d7   :  { %2184 = vtanh.f32 %v647_v60 }
 0x4e0   :  { %v2183_v8 = vpop.eup %2182 }
 0x4e1   :  { %v651_v12 = vadd.f32 1.0, %v2183_v8  ;;  %v2185_v13 = vpop.eup %2184 }
 0x4e3   :  { %2186 = vrcp.f32 %v651_v12 }
 0x4e4   :  { %2188 = vpow2.f32 %v1969_v21 }
 0x4ed   :  { %v2187_v33 = vpop.eup %2186 }
 0x4ee   :  { %v662_v34 = vmul.f32 %v2187_v33, %v2185_v13  ;;  %v2189_v23 = vpop.eup %2188  ;;  %v661_v35 = vmul.f32 %v2187_v33, %v2867_v59 }
 0x4ef   :  { %v658_v17 = vadd.f32 1.0, %v2189_v23 }
 0x4f0   :  { %664 = vrot.lane.b32.xlu1 %v662_v34, %s2564_s5 }
 0x4f1   :  { %2190 = vrcp.f32 %v658_v17 }
 0x4fb   :  { %v2191_v46 = vpop.eup %2190 }
 0x562   :  { %v665_v37 = vpop.permute.xlu1 %664 }
 0x563   :  { %v2954_v41 = vadd.f32 %v665_v37, %v661_v35 }
 0x565   :  { %2192 = vtanh.f32 %v2954_v41 }
 0x56f   :  { %v2193_v51 = vpop.eup %2192 }
 0x570   :  { %v669_v54 = vmul.f32 %v2193_v51, %v2191_v46 }
 0x572   :  { %v2029_v55 = vpack.c.bf16 %v669_v54, %v669_v54 }
 0x574   :  { %674 = vrot.lane.b32.xlu0 %v2029_v55, %s2564_s5 }
 0x5e6   :  { %v675_v57 = vpop.permute.xlu0 %674 }
 0x5e7   :  { %677 = vst.msk [vmem:[#allocation3] sm:$0xf] %vm450_vm2, %v675_v57 }
 0x5ee   :  { %v678_v58 = vld [vmem:[#allocation3] sm:$0xf] }
 0x5ef   :  { %712 = vmatmul.mubr.bf16.vlgmr.msra.gmra.mrb[8].mxu1 %v678_v58 }
 0x5f0   :  { %896 = vmatpush1.bf16.msra.mxu1 %v2753_v2  ;;  %927 = vmatprep.mubr.bf16.mxu1 %v2570_v0 }
 0x5f1   :  { %897 = vmatprep.subr.bf16.mxu1 %v2756_v3 }
 0x5f4   :  { %898 = vmatpush1.bf16.msra.mxu1 %v2758_v4 }
 0x5f5   :  { %899 = vmatprep.subr.bf16.mxu1 %v2762_v7 }
 0x5f8   :  { %900 = vmatpush1.bf16.msra.mxu1 %v2768_v9 }
 0x5f9   :  { %901 = vmatprep.subr.bf16.mxu1 %v2771_v10 }
 0x5fc   :  { %902 = vmatpush1.bf16.msra.mxu1 %v2774_v11 }
 0x5fd   :  { %969 = vmatprep.subr.bf16.mxu1 %v2812_v38 }
 0x6c2   :  { %v713_v59 = vpop.f32.mrb[8].mxu1 }
 0x6c3   :  { %v714_v60 = vadd.f32 %v713_v59, %v2917_v36  ;;  %v715_v15 = vpop.f32.mrb[9].mxu1 }
 0x6c4   :  { %v717_v61 = vpop.f32.mrb[10].mxu1  ;;  %v716_v12 = vadd.f32 %v715_v15, %v2922_v56  ;;  %v252_v15 = vadd.f32 %v2883_v18, %v2805_v22 }
 0x6c5   :  { %v1971_v6 = vmul.f32 -1.442695, %v714_v60  ;;  %v718_v8 = vpop.f32.mrb[11].mxu1 }
 0x6c6   :  { %v1972_v17 = vmul.f32 -1.442695, %v716_v12 }
 0x6c7   :  { %2194 = vpow2.f32 %v1971_v6 }
 0x6c8   :  { %2196 = vtanh.f32 %v716_v12 }
 0x6d1   :  { %v2195_v13 = vpop.eup %2194 }
 0x6d2   :  { %v723_v33 = vadd.f32 1.0, %v2195_v13  ;;  %v2197_v34 = vpop.eup %2196 }
 0x6d4   :  { %2198 = vrcp.f32 %v723_v33 }
 0x6d5   :  { %2200 = vpow2.f32 %v1972_v17 }
 0x6de   :  { %v2199_v21 = vpop.eup %2198 }
 0x6df   :  { %v734_v23 = vmul.f32 %v2199_v21, %v2197_v34  ;;  %v2201_v35 = vpop.eup %2200  ;;  %v733_v46 = vmul.f32 %v2199_v21, %v2926_v14  ;;  %v250_v14 = vadd.f32 %v2881_v16, %v2799_v20 }
 0x6e0   :  { %v730_v37 = vadd.f32 1.0, %v2201_v35 }
 0x6e1   :  { %736 = vrot.lane.b32.xlu1 %v734_v23, %s2564_s5 }
 0x6e2   :  { %2202 = vrcp.f32 %v730_v37 }
 0x6ec   :  { %v2203_v55 = vpop.eup %2202 }
 0x753   :  { %v737_v51 = vpop.permute.xlu1 %736 }
 0x754   :  { %v2972_v54 = vadd.f32 %v737_v51, %v733_v46 }
 0x756   :  { %2204 = vtanh.f32 %v2972_v54 }
 0x760   :  { %v2205_v57 = vpop.eup %2204 }
 0x761   :  { %v741_v58 = vmul.f32 %v2205_v57, %v2203_v55 }
 0x763   :  { %v742_v59 = vpack.c.bf16 %v741_v58, %v741_v58 }
 0x765   :  { %743 = vst.msk [vmem:[#allocation3] sm:$0xf] %vm597_vm3, %v742_v59 }
 0x76c   :  { %v746_v60 = vld [vmem:[#allocation3] sm:$0xf] }
 0x76d   :  { %1973 = vmatmul.mubr.msk.bf16.vlgmr.msra.gmra.mrb[20].mxu0 %vm374_vm1, %v746_v60 }
 0x76e   :  { %825 = vmatpush1.bf16.msra.mxu0 %v2814_v39  ;;  %856 = vmatprep.mubr.bf16.mxu0 %v2570_v0 }
 0x76f   :  { %826 = vmatprep.subr.bf16.mxu0 %v2816_v40 }
 0x772   :  { %827 = vmatpush1.bf16.msra.mxu0 %v2824_v42 }
 0x773   :  { %828 = vmatprep.subr.bf16.mxu0 %v2828_v43 }
 0x776   :  { %829 = vmatpush1.bf16.msra.mxu0 %v2832_v44 }
 0x777   :  { %830 = vmatprep.subr.bf16.mxu0 %v2835_v45 }
 0x77a   :  { %831 = vmatpush1.bf16.msra.mxu0 %v2841_v47 }
 0x77b   :  { %832 = vmatprep.subr.bf16.mxu0 %v2845_v48 }
 0x77e   :  { %833 = vmatpush1.bf16.msra.mxu0 %v2849_v49 }
 0x77f   :  { %834 = vmatprep.subr.bf16.mxu0 %v2852_v50 }
 0x782   :  { %835 = vmatpush1.bf16.msra.mxu0 %v2858_v52 }
 0x783   :  { %836 = vmatprep.subr.bf16.mxu0 %v2862_v53 }
 0x786   :  { %837 = vmatpush1.bf16.msra.mxu0 %v2870_v62 }
 0x787   :  { %838 = vmatprep.subr.bf16.mxu0 %v2873_v63 }
 0x78a   :  { %839 = vmatpush1.bf16.msra.mxu0 %v2875_v5 }
 0x78b   :  { %1040 = vmatprep.subr.bf16.mxu0 %v2751_v1 }
 0x840   :  { %v784_v61 = vpop.f32.mrb[20].mxu0 }
 0x841   :  { %v791_v6 = vadd.f32 %v784_v61, %v250_v14  ;;  %v786_v8 = vpop.f32.mrb[21].mxu0 }
 0x842   :  { %v792_v12 = vadd.f32 %v786_v8, %v252_v15  ;;  %v788_v13 = vpop.f32.mrb[22].mxu0 }
 0x843   :  { %v1974_v33 = vmul.f32 -1.442695, %v791_v6  ;;  %v789_v34 = vpop.f32.mrb[23].mxu0 }
 0x844   :  { %v1975_v16 = vmul.f32 -1.442695, %v792_v12 }
 0x845   :  { %2206 = vpow2.f32 %v1974_v33 }
 0x846   :  { %2208 = vtanh.f32 %v792_v12 }
 0x84f   :  { %v2207_v21 = vpop.eup %2206 }
 0x850   :  { %v796_v23 = vadd.f32 1.0, %v2207_v21  ;;  %v2209_v17 = vpop.eup %2208 }
 0x852   :  { %2210 = vrcp.f32 %v796_v23 }
 0x853   :  { %2212 = vpow2.f32 %v1975_v16 }
 0x85c   :  { %v2211_v35 = vpop.eup %2210 }
 0x85d   :  { %v807_v37 = vmul.f32 %v2211_v35, %v2209_v17  ;;  %v2213_v18 = vpop.eup %2212  ;;  %v806_v51 = vmul.f32 %v2211_v35, %v2954_v41 }
 0x85e   :  { %v803_v46 = vadd.f32 1.0, %v2213_v18 }
 0x85f   :  { %809 = vrot.lane.b32.xlu0 %v807_v37, %s2564_s5 }
 0x860   :  { %2214 = vrcp.f32 %v803_v46 }
 0x86a   :  { %v2215_v58 = vpop.eup %2214 }
 0x8d1   :  { %v810_v55 = vpop.permute.xlu0 %809 }
 0x8d2   :  { %v3000_v57 = vadd.f32 %v810_v55, %v806_v51 }
 0x8d4   :  { %2216 = vtanh.f32 %v3000_v57 }
 0x8de   :  { %v2217_v59 = vpop.eup %2216 }
 0x8df   :  { %v814_v60 = vmul.f32 %v2217_v59, %v2215_v58 }
 0x8e1   :  { %v2030_v14 = vpack.c.bf16 %v814_v60, %v814_v60 }
 0x8e3   :  { %819 = vrot.lane.b32.xlu1 %v2030_v14, %s2564_s5 }
 0x955   :  { %v820_v15 = vpop.permute.xlu1 %819 }
 0x956   :  { %822 = vst.msk [vmem:[#allocation3] sm:$0xf] %vm450_vm2, %v820_v15 }
 0x95d   :  { %v823_v61 = vld [vmem:[#allocation3] sm:$0xf] }
 0x95e   :  { %857 = vmatmul.mubr.bf16.vlgmr.msra.gmra.mrb[24].mxu0 %v823_v61 }
 0x95f   :  { %1041 = vmatpush1.bf16.msra.mxu0 %v2753_v2  ;;  %1072 = vmatprep.mubr.bf16.mxu0 %v2570_v0 }
 0x960   :  { %1042 = vmatprep.subr.bf16.mxu0 %v2756_v3 }
 0x963   :  { %1043 = vmatpush1.bf16.msra.mxu0 %v2758_v4 }
 0x964   :  { %1044 = vmatprep.subr.bf16.mxu0 %v2762_v7 }
 0x967   :  { %1045 = vmatpush1.bf16.msra.mxu0 %v2768_v9 }
 0x968   :  { %1046 = vmatprep.subr.bf16.mxu0 %v2771_v10 }
 0x96b   :  { %1047 = vmatpush1.bf16.msra.mxu0 %v2774_v11 }
 0x96c   :  { %1114 = vmatprep.subr.bf16.mxu0 %v2812_v38 }
 0xa31   :  { %v858_v41 = vpop.f32.mrb[24].mxu0 }
 0xa32   :  { %v859_v6 = vadd.f32 %v858_v41, %v2917_v36  ;;  %v860_v8 = vpop.f32.mrb[25].mxu0  ;;  %v256_v41 = vadd.f32 %v2887_v24, %v2805_v22 }
 0xa33   :  { %v862_v12 = vpop.f32.mrb[26].mxu0  ;;  %v861_v34 = vadd.f32 %v860_v8, %v2922_v56 }
 0xa34   :  { %v1977_v13 = vmul.f32 -1.442695, %v859_v6  ;;  %v863_v33 = vpop.f32.mrb[27].mxu0 }
 0xa35   :  { %v1978_v16 = vmul.f32 -1.442695, %v861_v34 }
 0xa36   :  { %2218 = vpow2.f32 %v1977_v13 }
 0xa37   :  { %2220 = vtanh.f32 %v861_v34 }
 0xa40   :  { %v2219_v21 = vpop.eup %2218 }
 0xa41   :  { %v868_v23 = vadd.f32 1.0, %v2219_v21  ;;  %v2221_v17 = vpop.eup %2220 }
 0xa43   :  { %2222 = vrcp.f32 %v868_v23 }
 0xa44   :  { %2224 = vpow2.f32 %v1978_v16 }
 0xa4d   :  { %v2223_v35 = vpop.eup %2222 }
 0xa4e   :  { %v879_v37 = vmul.f32 %v2223_v35, %v2221_v17  ;;  %v2225_v18 = vpop.eup %2224  ;;  %v878_v51 = vmul.f32 %v2223_v35, %v2972_v54  ;;  %v254_v54 = vadd.f32 %v2885_v19, %v2799_v20 }
 0xa4f   :  { %v875_v46 = vadd.f32 1.0, %v2225_v18 }
 0xa50   :  { %881 = vrot.lane.b32.xlu0 %v879_v37, %s2564_s5 }
 0xa51   :  { %2226 = vrcp.f32 %v875_v46 }
 0xa5b   :  { %v2227_v59 = vpop.eup %2226 }
 0xac2   :  { %v882_v55 = vpop.permute.xlu0 %881 }
 0xac3   :  { %v3018_v58 = vadd.f32 %v882_v55, %v878_v51 }
 0xac5   :  { %2228 = vtanh.f32 %v3018_v58 }
 0xacf   :  { %v2229_v60 = vpop.eup %2228 }
 0xad0   :  { %v886_v14 = vmul.f32 %v2229_v60, %v2227_v59 }
 0xad2   :  { %v887_v15 = vpack.c.bf16 %v886_v14, %v886_v14 }
 0xad4   :  { %888 = vst.msk [vmem:[#allocation3] sm:$0xf] %vm597_vm3, %v887_v15 }
 0xadb   :  { %v891_v61 = vld [vmem:[#allocation3] sm:$0xf] }
 0xadc   :  { %1979 = vmatmul.mubr.msk.bf16.vlgmr.msra.gmra.mrb[12].mxu1 %vm374_vm1, %v891_v61 }
 0xadd   :  { %970 = vmatpush1.bf16.msra.mxu1 %v2814_v39  ;;  %1001 = vmatprep.mubr.bf16.mxu1 %v2570_v0 }
 0xade   :  { %971 = vmatprep.subr.bf16.mxu1 %v2816_v40 }
 0xae1   :  { %972 = vmatpush1.bf16.msra.mxu1 %v2824_v42 }
 0xae2   :  { %973 = vmatprep.subr.bf16.mxu1 %v2828_v43 }
 0xae5   :  { %974 = vmatpush1.bf16.msra.mxu1 %v2832_v44 }
 0xae6   :  { %975 = vmatprep.subr.bf16.mxu1 %v2835_v45 }
 0xae9   :  { %976 = vmatpush1.bf16.msra.mxu1 %v2841_v47 }
 0xaea   :  { %977 = vmatprep.subr.bf16.mxu1 %v2845_v48 }
 0xaed   :  { %978 = vmatpush1.bf16.msra.mxu1 %v2849_v49 }
 0xaee   :  { %979 = vmatprep.subr.bf16.mxu1 %v2852_v50 }
 0xaf1   :  { %980 = vmatpush1.bf16.msra.mxu1 %v2858_v52 }
 0xaf2   :  { %981 = vmatprep.subr.bf16.mxu1 %v2862_v53 }
 0xaf5   :  { %982 = vmatpush1.bf16.msra.mxu1 %v2870_v62 }
 0xaf6   :  { %983 = vmatprep.subr.bf16.mxu1 %v2873_v63 }
 0xaf9   :  { %984 = vmatpush1.bf16.msra.mxu1 %v2875_v5 }
 0xafa   :  { %1185 = vmatprep.subr.bf16.mxu1 %v2751_v1 }
 0xbaf   :  { %v929_v6 = vpop.f32.mrb[12].mxu1 }
 0xbb0   :  { %v936_v8 = vadd.f32 %v929_v6, %v254_v54  ;;  %v931_v12 = vpop.f32.mrb[13].mxu1 }
 0xbb1   :  { %v937_v13 = vadd.f32 %v931_v12, %v256_v41  ;;  %v933_v33 = vpop.f32.mrb[14].mxu1 }
 0xbb2   :  { %v1980_v34 = vmul.f32 -1.442695, %v936_v8  ;;  %v934_v21 = vpop.f32.mrb[15].mxu1 }
 0xbb3   :  { %v1981_v19 = vmul.f32 -1.442695, %v937_v13 }
 0xbb4   :  { %2230 = vpow2.f32 %v1980_v34 }
 0xbb5   :  { %2232 = vtanh.f32 %v937_v13 }
 0xbbe   :  { %v2231_v23 = vpop.eup %2230 }
 0xbbf   :  { %v941_v17 = vadd.f32 1.0, %v2231_v23  ;;  %v2233_v35 = vpop.eup %2232 }
 0xbc1   :  { %2234 = vrcp.f32 %v941_v17 }
 0xbc2   :  { %2236 = vpow2.f32 %v1981_v19 }
 0xbcb   :  { %v2235_v1 = vpop.eup %2234 }
 0xbcc   :  { %v952_v37 = vmul.f32 %v2235_v1, %v2233_v35  ;;  %v2237_v24 = vpop.eup %2236  ;;  %v951_v18 = vmul.f32 %v2235_v1, %v3000_v57 }
 0xbcd   :  { %v948_v16 = vadd.f32 1.0, %v2237_v24  ;;  %v260_v24 = vadd.f32 %v2889_v25, %v2799_v20 }
 0xbce   :  { %954 = vrot.lane.b32.xlu1 %v952_v37, %s2564_s5 }
 0xbcf   :  { %2238 = vrcp.f32 %v948_v16  ;;  %v262_v16 = vadd.f32 %v2891_v26, %v2805_v22 }
 0xbd9   :  { %v2239_v55 = vpop.eup %2238 }
 0xc40   :  { %v955_v46 = vpop.permute.xlu1 %954 }
 0xc41   :  { %v3046_v51 = vadd.f32 %v955_v46, %v951_v18 }
 0xc43   :  { %2240 = vtanh.f32 %v3046_v51 }
 0xc4d   :  { %v2241_v59 = vpop.eup %2240 }
 0xc4e   :  { %v959_v60 = vmul.f32 %v2241_v59, %v2239_v55 }
 0xc50   :  { %v2031_v14 = vpack.c.bf16 %v959_v60, %v959_v60 }
 0xc52   :  { %964 = vrot.lane.b32.xlu0 %v2031_v14, %s2564_s5 }
 0xcc4   :  { %v965_v15 = vpop.permute.xlu0 %964 }
 0xcc5   :  { %967 = vst.msk [vmem:[#allocation3] sm:$0xf] %vm450_vm2, %v965_v15 }
 0xccc   :  { %v968_v61 = vld [vmem:[#allocation3] sm:$0xf] }
 0xccd   :  { %1002 = vmatmul.mubr.bf16.vlgmr.msra.gmra.mrb[16].mxu1 %v968_v61 }
 0xcce   :  { %1186 = vmatpush1.bf16.msra.mxu1 %v2753_v2  ;;  %1217 = vmatprep.mubr.bf16.mxu1 %v2570_v0 }
 0xccf   :  { %1187 = vmatprep.subr.bf16.mxu1 %v2756_v3 }
 0xcd2   :  { %1188 = vmatpush1.bf16.msra.mxu1 %v2758_v4 }
 0xcd3   :  { %1189 = vmatprep.subr.bf16.mxu1 %v2762_v7 }
 0xcd6   :  { %1190 = vmatpush1.bf16.msra.mxu1 %v2768_v9 }
 0xcd7   :  { %1191 = vmatprep.subr.bf16.mxu1 %v2771_v10 }
 0xcda   :  { %1192 = vmatpush1.bf16.msra.mxu1 %v2774_v11 }
 0xcdb   :  { %1259 = vmatprep.subr.bf16.mxu1 %v2812_v38 }
 0xda0   :  { %v1003_v57 = vpop.f32.mrb[16].mxu1 }
 0xda1   :  { %v1004_v54 = vadd.f32 %v1003_v57, %v2917_v36  ;;  %v1005_v2 = vpop.f32.mrb[17].mxu1 }
 0xda2   :  { %v1007_v41 = vpop.f32.mrb[18].mxu1  ;;  %v1006_v3 = vadd.f32 %v1005_v2, %v2922_v56 }
 0xda3   :  { %v1983_v6 = vmul.f32 -1.442695, %v1004_v54  ;;  %v1008_v8 = vpop.f32.mrb[19].mxu1 }
 0xda4   :  { %v1984_v11 = vmul.f32 -1.442695, %v1006_v3 }
 0xda5   :  { %2242 = vpow2.f32 %v1983_v6 }
 0xda6   :  { %2244 = vtanh.f32 %v1006_v3 }
 0xdaf   :  { %v2243_v4 = vpop.eup %2242 }
 0xdb0   :  { %v1013_v7 = vadd.f32 1.0, %v2243_v4  ;;  %v2245_v9 = vpop.eup %2244 }
 0xdb2   :  { %2246 = vrcp.f32 %v1013_v7 }
 0xdb3   :  { %2248 = vpow2.f32 %v1984_v11 }
 0xdbc   :  { %v2247_v10 = vpop.eup %2246 }
 0xdbd   :  { %v1024_v12 = vmul.f32 %v2247_v10, %v2245_v9  ;;  %v2249_v13 = vpop.eup %2248  ;;  %v1023_v34 = vmul.f32 %v2247_v10, %v3018_v58  ;;  %v3085_v58 = vld [vmem:[#allocation9 + $0x4] ss:$8 sps:$4 sm:$0xff]  }
 0xdbe   :  { %v1020_v33 = vadd.f32 1.0, %v2249_v13 }
 0xdbf   :  { %1026 = vrot.lane.b32.xlu1 %v1024_v12, %s2564_s5 }
 0xdc0   :  { %2250 = vrcp.f32 %v1020_v33  ;;  %v3099_v33 = vld [vmem:[#allocation9] ss:$8 sps:$4 sm:$0xff]  }
 0xdca   :  { %v2251_v17 = vpop.eup %2250 }
 0xe31   :  { %v1027_v21 = vpop.permute.xlu1 %1026 }
 0xe32   :  { %v3064_v23 = vadd.f32 %v1027_v21, %v1023_v34  ;;  %v3106_v34 = vld [vmem:[#allocation9 + $0x10] ss:$8 sps:$4 sm:$0xff]   ;;  %v3109_v21 = vld [vmem:[#allocation9 + $0x24] ss:$8 sps:$4 sm:$0xff]  }
 0xe34   :  { %2252 = vtanh.f32 %v3064_v23 }
 0xe3e   :  { %v2253_v35 = vpop.eup %2252 }
 0xe3f   :  { %v1031_v1 = vmul.f32 %v2253_v35, %v2251_v17  ;;  %v3112_v17 = vld [vmem:[#allocation9 + $0x20] ss:$8 sps:$4 sm:$0xff]   ;;  %v3115_v35 = vld [vmem:[#allocation9 + $0x34] ss:$8 sps:$4 sm:$0xff]  }
 0xe41   :  { %v1032_v37 = vpack.c.bf16 %v1031_v1, %v1031_v1  ;;  %v3118_v1 = vld [vmem:[#allocation9 + $0x30] ss:$8 sps:$4 sm:$0xff]  }
 0xe43   :  { %1033 = vst.msk [vmem:[#allocation3] sm:$0xf] %vm597_vm3, %v1032_v37 }
 0xe4a   :  { %v1036_v19 = vld [vmem:[#allocation3] sm:$0xf] }
 0xe4b   :  { %1985 = vmatmul.mubr.msk.bf16.vlgmr.msra.gmra.mrb[28].mxu0 %vm374_vm1, %v1036_v19 }
 0xe4c   :  { %1115 = vmatpush1.bf16.msra.mxu0 %v2814_v39  ;;  %1146 = vmatprep.mubr.bf16.mxu0 %v2570_v0 }
 0xe4d   :  { %1116 = vmatprep.subr.bf16.mxu0 %v2816_v40 }
 0xe50   :  { %1117 = vmatpush1.bf16.msra.mxu0 %v2824_v42 }
 0xe51   :  { %1118 = vmatprep.subr.bf16.mxu0 %v2828_v43 }
 0xe54   :  { %1119 = vmatpush1.bf16.msra.mxu0 %v2832_v44 }
 0xe55   :  { %1120 = vmatprep.subr.bf16.mxu0 %v2835_v45 }
 0xe58   :  { %1121 = vmatpush1.bf16.msra.mxu0 %v2841_v47 }
 0xe59   :  { %1122 = vmatprep.subr.bf16.mxu0 %v2845_v48 }
 0xe5c   :  { %1123 = vmatpush1.bf16.msra.mxu0 %v2849_v49 }
 0xe5d   :  { %1124 = vmatprep.subr.bf16.mxu0 %v2852_v50 }
 0xe60   :  { %1125 = vmatpush1.bf16.msra.mxu0 %v2858_v52 }
 0xe61   :  { %1126 = vmatprep.subr.bf16.mxu0 %v2862_v53 }
 0xe64   :  { %1127 = vmatpush1.bf16.msra.mxu0 %v2870_v62 }
 0xe65   :  { %1128 = vmatprep.subr.bf16.mxu0 %v2873_v63 }
 0xe68   :  { %1129 = vmatpush1.bf16.msra.mxu0 %v2875_v5 }
 0xe69   :  { %1330 = vmatprep.subr.bf16.mxu0 %v3085_v58 }
 0xf1e   :  { %v1074_v18 = vpop.f32.mrb[28].mxu0 }
 0xf1f   :  { %v1081_v46 = vadd.f32 %v1074_v18, %v260_v24  ;;  %v1076_v55 = vpop.f32.mrb[29].mxu0 }
 0xf20   :  { %v1082_v59 = vadd.f32 %v1076_v55, %v262_v16  ;;  %v1078_v60 = vpop.f32.mrb[30].mxu0 }
 0xf21   :  { %v1986_v14 = vmul.f32 -1.442695, %v1081_v46  ;;  %v1079_v15 = vpop.f32.mrb[31].mxu0 }
 0xf22   :  { %v1987_v25 = vmul.f32 -1.442695, %v1082_v59 }
 0xf23   :  { %2254 = vpow2.f32 %v1986_v14 }
 0xf24   :  { %2256 = vtanh.f32 %v1082_v59 }
 0xf2d   :  { %v2255_v61 = vpop.eup %2254 }
 0xf2e   :  { %v1086_v57 = vadd.f32 1.0, %v2255_v61  ;;  %v2257_v54 = vpop.eup %2256 }
 0xf30   :  { %2258 = vrcp.f32 %v1086_v57 }
 0xf31   :  { %2260 = vpow2.f32 %v1987_v25 }
 0xf3a   :  { %v2259_v2 = vpop.eup %2258 }
 0xf3b   :  { %v1097_v41 = vmul.f32 %v2259_v2, %v2257_v54  ;;  %v2261_v26 = vpop.eup %2260  ;;  %v1096_v8 = vmul.f32 %v2259_v2, %v3046_v51  ;;  %v3103_v51 = vld [vmem:[#allocation9 + $0x14] ss:$8 sps:$4 sm:$0xff]  }
 0xf3c   :  { %v1093_v6 = vadd.f32 1.0, %v2261_v26 }
 0xf3d   :  { %1099 = vrot.lane.b32.xlu0 %v1097_v41, %s2564_s5 }
 0xf3e   :  { %2262 = vrcp.f32 %v1093_v6 }
 0xf48   :  { %v2263_v7 = vpop.eup %2262 }
 0xfaf   :  { %v1100_v3 = vpop.permute.xlu0 %1099 }
 0xfb0   :  { %v3094_v4 = vadd.f32 %v1100_v3, %v1096_v8 }
 0xfb2   :  { %2264 = vtanh.f32 %v3094_v4 }
 0xfbc   :  { %v2265_v9 = vpop.eup %2264 }
 0xfbd   :  { %v1104_v10 = vmul.f32 %v2265_v9, %v2263_v7 }
 0xfbf   :  { %v2032_v12 = vpack.c.bf16 %v1104_v10, %v1104_v10 }
 0xfc1   :  { %1109 = vrot.lane.b32.xlu1 %v2032_v12, %s2564_s5 }
0x1033   :  { %v1110_v11 = vpop.permute.xlu1 %1109 }
0x1034   :  { %1112 = vst.msk [vmem:[#allocation3] sm:$0xf] %vm450_vm2, %v1110_v11 }
0x103b   :  { %v1113_v13 = vld [vmem:[#allocation3] sm:$0xf] }
0x103c   :  { %1147 = vmatmul.mubr.bf16.vlgmr.msra.gmra.mrb[32].mxu0 %v1113_v13 }
0x103d   :  { %1331 = vmatpush1.bf16.msra.mxu0 %v3099_v33  ;;  %1362 = vmatprep.mubr.bf16.mxu0 %v2570_v0 }
0x103e   :  { %1332 = vmatprep.subr.bf16.mxu0 %v3103_v51 }
0x1041   :  { %1333 = vmatpush1.bf16.msra.mxu0 %v3106_v34 }
0x1042   :  { %1334 = vmatprep.subr.bf16.mxu0 %v3109_v21 }
0x1045   :  { %1335 = vmatpush1.bf16.msra.mxu0 %v3112_v17 }
0x1046   :  { %1336 = vmatprep.subr.bf16.mxu0 %v3115_v35 }
0x1049   :  { %1337 = vmatpush1.bf16.msra.mxu0 %v3118_v1 }
0x104a   :  { %1404 = vmatprep.subr.bf16.mxu0 %v2812_v38 }
0x110f   :  { %v1148_v37 = vpop.f32.mrb[32].mxu0 }
0x1110   :  { %v1149_v19 = vadd.f32 %v1148_v37, %v2917_v36  ;;  %v1150_v24 = vpop.f32.mrb[33].mxu0 }
0x1111   :  { %v1152_v16 = vpop.f32.mrb[34].mxu0  ;;  %v1151_v55 = vadd.f32 %v1150_v24, %v2922_v56 }
0x1112   :  { %v1989_v18 = vmul.f32 -1.442695, %v1149_v19  ;;  %v1153_v46 = vpop.f32.mrb[35].mxu0 }
0x1113   :  { %v1990_v38 = vmul.f32 -1.442695, %v1151_v55 }
0x1114   :  { %2266 = vpow2.f32 %v1989_v18 }
0x1115   :  { %2268 = vtanh.f32 %v1151_v55 }
0x111e   :  { %v2267_v59 = vpop.eup %2266 }
0x111f   :  { %v1158_v60 = vadd.f32 1.0, %v2267_v59  ;;  %v2269_v14 = vpop.eup %2268 }
0x1121   :  { %2270 = vrcp.f32 %v1158_v60 }
0x1122   :  { %2272 = vpow2.f32 %v1990_v38 }
0x112b   :  { %v2271_v15 = vpop.eup %2270 }
0x112c   :  { %v1169_v61 = vmul.f32 %v2271_v15, %v2269_v14  ;;  %v2273_v57 = vpop.eup %2272  ;;  %v1168_v2 = vmul.f32 %v2271_v15, %v3064_v23 }
0x112d   :  { %v1165_v54 = vadd.f32 1.0, %v2273_v57 }
0x112e   :  { %1171 = vrot.lane.b32.xlu0 %v1169_v61, %s2564_s5 }
0x112f   :  { %2274 = vrcp.f32 %v1165_v54 }
0x1139   :  { %v2275_v26 = vpop.eup %2274 }
0x11a0   :  { %v1172_v41 = vpop.permute.xlu0 %1171 }
0x11a1   :  { %v3126_v25 = vadd.f32 %v1172_v41, %v1168_v2 }
0x11a3   :  { %2276 = vtanh.f32 %v3126_v25 }
0x11ad   :  { %v2277_v6 = vpop.eup %2276 }
0x11ae   :  { %v1176_v8 = vmul.f32 %v2277_v6, %v2275_v26 }
0x11b0   :  { %v1177_v3 = vpack.c.bf16 %v1176_v8, %v1176_v8  ;;  %v3176_v8 = vld [vmem:[#allocation10] ss:$8 sps:$4 sm:$0xff]  }
0x11b2   :  { %1178 = vst.msk [vmem:[#allocation3] sm:$0xf] %vm597_vm3, %v1177_v3  ;;  %v3183_v3 = vld [vmem:[#allocation10 + $0x10] ss:$8 sps:$4 sm:$0xff]  }
0x11b9   :  { %v1181_v7 = vld [vmem:[#allocation3] sm:$0xf] }
0x11ba   :  { %1991 = vmatmul.mubr.msk.bf16.vlgmr.msra.gmra.mrb[20].mxu1 %vm374_vm1, %v1181_v7  ;;  %v3186_v7 = vld [vmem:[#allocation10 + $0x24] ss:$8 sps:$4 sm:$0xff]  }
0x11bb   :  { %1260 = vmatpush1.bf16.msra.mxu1 %v2814_v39  ;;  %1291 = vmatprep.mubr.bf16.mxu1 %v2570_v0  ;;  %v264_v39 = vadd.f32 %v2893_v27, %v2799_v20 }
0x11bc   :  { %1261 = vmatprep.subr.bf16.mxu1 %v2816_v40  ;;  %v266_v40 = vadd.f32 %v2895_v28, %v2805_v22 }
0x11bf   :  { %1262 = vmatpush1.bf16.msra.mxu1 %v2824_v42 }
0x11c0   :  { %1263 = vmatprep.subr.bf16.mxu1 %v2828_v43 }
0x11c3   :  { %1264 = vmatpush1.bf16.msra.mxu1 %v2832_v44 }
0x11c4   :  { %1265 = vmatprep.subr.bf16.mxu1 %v2835_v45 }
0x11c7   :  { %1266 = vmatpush1.bf16.msra.mxu1 %v2841_v47 }
0x11c8   :  { %1267 = vmatprep.subr.bf16.mxu1 %v2845_v48 }
0x11cb   :  { %1268 = vmatpush1.bf16.msra.mxu1 %v2849_v49 }
0x11cc   :  { %1269 = vmatprep.subr.bf16.mxu1 %v2852_v50 }
0x11cf   :  { %1270 = vmatpush1.bf16.msra.mxu1 %v2858_v52 }
0x11d0   :  { %1271 = vmatprep.subr.bf16.mxu1 %v2862_v53 }
0x11d3   :  { %1272 = vmatpush1.bf16.msra.mxu1 %v2870_v62 }
0x11d4   :  { %1273 = vmatprep.subr.bf16.mxu1 %v2873_v63 }
0x11d7   :  { %1274 = vmatpush1.bf16.msra.mxu1 %v2875_v5 }
0x11d8   :  { %1475 = vmatprep.subr.bf16.mxu1 %v3085_v58 }
0x128d   :  { %v1219_v42 = vpop.f32.mrb[20].mxu1 }
0x128e   :  { %v1226_v43 = vadd.f32 %v1219_v42, %v264_v39  ;;  %v1221_v44 = vpop.f32.mrb[21].mxu1  ;;  %v3189_v39 = vld [vmem:[#allocation10 + $0x20] ss:$8 sps:$4 sm:$0xff]   ;;  %v3195_v42 = vld [vmem:[#allocation10 + $0x30] ss:$8 sps:$4 sm:$0xff]  }
0x128f   :  { %v1227_v45 = vadd.f32 %v1221_v44, %v266_v40  ;;  %v1223_v47 = vpop.f32.mrb[22].mxu1  ;;  %v3192_v40 = vld [vmem:[#allocation10 + $0x34] ss:$8 sps:$4 sm:$0xff]   ;;  %v3201_v44 = vld [vmem:[#allocation10 + $0x40] ss:$8 sps:$4 sm:$0xff]  }
0x1290   :  { %v1992_v48 = vmul.f32 -1.442695, %v1226_v43  ;;  %v1224_v49 = vpop.f32.mrb[23].mxu1  ;;  %v3198_v43 = vld [vmem:[#allocation10 + $0x44] ss:$8 sps:$4 sm:$0xff]  }
0x1291   :  { %v1993_v27 = vmul.f32 -1.442695, %v1227_v45  ;;  %v3207_v47 = vld [vmem:[#allocation10 + $0x50] ss:$8 sps:$4 sm:$0xff]   ;;  %v3214_v49 = vld [vmem:[#allocation10 + $0x74] ss:$8 sps:$4 sm:$0xff]  }
0x1292   :  { %2278 = vpow2.f32 %v1992_v48  ;;  %v3210_v48 = vld [vmem:[#allocation10 + $0x64] ss:$8 sps:$4 sm:$0xff]  }
0x1293   :  { %2280 = vtanh.f32 %v1227_v45  ;;  %v3204_v45 = vld [vmem:[#allocation10 + $0x54] ss:$8 sps:$4 sm:$0xff]  }
0x129c   :  { %v2279_v50 = vpop.eup %2278 }
0x129d   :  { %v1231_v52 = vadd.f32 1.0, %v2279_v50  ;;  %v2281_v53 = vpop.eup %2280  ;;  %v3217_v50 = vld [vmem:[#allocation10 + $0x70] ss:$8 sps:$4 sm:$0xff]  }
0x129f   :  { %2282 = vrcp.f32 %v1231_v52  ;;  %v270_v52 = vadd.f32 %v2897_v29, %v2799_v20 }
0x12a0   :  { %2284 = vpow2.f32 %v1993_v27 }
0x12a9   :  { %v2283_v63 = vpop.eup %2282 }
0x12aa   :  { %v1242_v5 = vmul.f32 %v2283_v63, %v2281_v53  ;;  %v2285_v28 = vpop.eup %2284  ;;  %v1241_v58 = vmul.f32 %v2283_v63, %v3094_v4  ;;  %v2358_v4 = vld [vmem:[#allocation10 + $0x4] ss:$8 sps:$4 sm:$0xff]   ;;  %v272_v53 = vadd.f32 %v2899_v30, %v2805_v22 }
0x12ab   :  { %v1238_v23 = vadd.f32 1.0, %v2285_v28 }
0x12ac   :  { %1244 = vrot.lane.b32.xlu1 %v1242_v5, %s2564_s5 }
0x12ad   :  { %2286 = vrcp.f32 %v1238_v23 }
0x12b7   :  { %v2287_v12 = vpop.eup %2286 }
0x131e   :  { %v1245_v9 = vpop.permute.xlu1 %1244 }
0x131f   :  { %v3154_v10 = vadd.f32 %v1245_v9, %v1241_v58 }
0x1321   :  { %2288 = vtanh.f32 %v3154_v10 }
0x132b   :  { %v2289_v11 = vpop.eup %2288 }
0x132c   :  { %v1249_v13 = vmul.f32 %v2289_v11, %v2287_v12 }
0x132e   :  { %v2033_v37 = vpack.c.bf16 %v1249_v13, %v1249_v13 }
0x1330   :  { %1254 = vrot.lane.b32.xlu0 %v2033_v37, %s2564_s5 }
0x13a2   :  { %v1255_v19 = vpop.permute.xlu0 %1254 }
0x13a3   :  { %1257 = vst.msk [vmem:[#allocation3] sm:$0xf] %vm450_vm2, %v1255_v19 }
0x13aa   :  { %v1258_v24 = vld [vmem:[#allocation3] sm:$0xf] }
0x13ab   :  { %1292 = vmatmul.mubr.bf16.vlgmr.msra.gmra.mrb[24].mxu1 %v1258_v24 }
0x13ac   :  { %1476 = vmatpush1.bf16.msra.mxu1 %v3099_v33  ;;  %1507 = vmatprep.mubr.bf16.mxu1 %v2570_v0 }
0x13ad   :  { %1477 = vmatprep.subr.bf16.mxu1 %v3103_v51 }
0x13b0   :  { %1478 = vmatpush1.bf16.msra.mxu1 %v3106_v34 }
0x13b1   :  { %1479 = vmatprep.subr.bf16.mxu1 %v3109_v21 }
0x13b4   :  { %1480 = vmatpush1.bf16.msra.mxu1 %v3112_v17 }
0x13b5   :  { %1481 = vmatprep.subr.bf16.mxu1 %v3115_v35 }
0x13b8   :  { %1482 = vmatpush1.bf16.msra.mxu1 %v3118_v1 }
0x13b9   :  { %1549 = vmatprep.subr.bf16.mxu1 %v2358_v4 }
0x147e   :  { %v1293_v16 = vpop.f32.mrb[24].mxu1 }
0x147f   :  { %v1294_v18 = vadd.f32 %v1293_v16, %v2917_v36  ;;  %v1295_v33 = vpop.f32.mrb[25].mxu1 }
0x1480   :  { %v1297_v46 = vpop.f32.mrb[26].mxu1  ;;  %v1296_v51 = vadd.f32 %v1295_v33, %v2922_v56 }
0x1481   :  { %v1995_v55 = vmul.f32 -1.442695, %v1294_v18  ;;  %v1298_v59 = vpop.f32.mrb[27].mxu1 }
0x1482   :  { %v1996_v1 = vmul.f32 -1.442695, %v1296_v51 }
0x1483   :  { %2290 = vpow2.f32 %v1995_v55 }
0x1484   :  { %2292 = vtanh.f32 %v1296_v51 }
0x148d   :  { %v2291_v34 = vpop.eup %2290 }
0x148e   :  { %v1303_v21 = vadd.f32 1.0, %v2291_v34  ;;  %v2293_v17 = vpop.eup %2292 }
0x1490   :  { %2294 = vrcp.f32 %v1303_v21 }
0x1491   :  { %2296 = vpow2.f32 %v1996_v1 }
0x149a   :  { %v2295_v35 = vpop.eup %2294 }
0x149b   :  { %v1314_v60 = vmul.f32 %v2295_v35, %v2293_v17  ;;  %v2297_v14 = vpop.eup %2296  ;;  %v1313_v61 = vmul.f32 %v2295_v35, %v3126_v25  ;;  %v3180_v25 = vld [vmem:[#allocation10 + $0x14] ss:$8 sps:$4 sm:$0xff]  }
0x149c   :  { %v1310_v15 = vadd.f32 1.0, %v2297_v14 }
0x149d   :  { %1316 = vrot.lane.b32.xlu1 %v1314_v60, %s2564_s5 }
0x149e   :  { %2298 = vrcp.f32 %v1310_v15 }
0x14a8   :  { %v2299_v54 = vpop.eup %2298 }
0x150f   :  { %v1317_v38 = vpop.permute.xlu1 %1316 }
0x1510   :  { %v3171_v57 = vadd.f32 %v1317_v38, %v1313_v61 }
0x1512   :  { %2300 = vtanh.f32 %v3171_v57 }
0x151c   :  { %v2301_v2 = vpop.eup %2300 }
0x151d   :  { %v1321_v41 = vmul.f32 %v2301_v2, %v2299_v54 }
0x151f   :  { %v1322_v26 = vpack.c.bf16 %v1321_v41, %v1321_v41 }
0x1521   :  { %1323 = vst.msk [vmem:[#allocation3] sm:$0xf] %vm597_vm3, %v1322_v26 }
0x1528   :  { %v1326_v6 = vld [vmem:[#allocation3] sm:$0xf] }
0x1529   :  { %1997 = vmatmul.mubr.msk.bf16.vlgmr.msra.gmra.mrb[36].mxu0 %vm374_vm1, %v1326_v6 }
0x152a   :  { %1405 = vmatpush1.bf16.msra.mxu0 %v3176_v8  ;;  %1436 = vmatprep.mubr.bf16.mxu0 %v2570_v0 }
0x152b   :  { %1406 = vmatprep.subr.bf16.mxu0 %v3180_v25 }
0x152e   :  { %1407 = vmatpush1.bf16.msra.mxu0 %v3183_v3 }
0x152f   :  { %1408 = vmatprep.subr.bf16.mxu0 %v3186_v7 }
0x1532   :  { %1409 = vmatpush1.bf16.msra.mxu0 %v3189_v39 }
0x1533   :  { %1410 = vmatprep.subr.bf16.mxu0 %v3192_v40 }
0x1536   :  { %1411 = vmatpush1.bf16.msra.mxu0 %v3195_v42 }
0x1537   :  { %1412 = vmatprep.subr.bf16.mxu0 %v3198_v43 }
0x153a   :  { %1413 = vmatpush1.bf16.msra.mxu0 %v3201_v44 }
0x153b   :  { %1414 = vmatprep.subr.bf16.mxu0 %v3204_v45 }
0x153e   :  { %1415 = vmatpush1.bf16.msra.mxu0 %v3207_v47 }
0x153f   :  { %1416 = vmatprep.subr.bf16.mxu0 %v3210_v48 }
0x1542   :  { %1417 = vmatpush1.bf16.msra.mxu0 %v2870_v62 }
0x1543   :  { %1418 = vmatprep.subr.bf16.mxu0 %v3214_v49 }
0x1546   :  { %1419 = vmatpush1.bf16.msra.mxu0 %v3217_v50 }
0x15fc   :  { %v1364_v63 = vpop.f32.mrb[36].mxu0 }
0x15fd   :  { %v1371_v5 = vadd.f32 %v1364_v63, %v270_v52  ;;  %v1366_v27 = vpop.f32.mrb[37].mxu0 }
0x15fe   :  { %v1372_v28 = vadd.f32 %v1366_v27, %v272_v53  ;;  %v1368_v23 = vpop.f32.mrb[38].mxu0 }
0x15ff   :  { %v1998_v58 = vmul.f32 -1.442695, %v1371_v5  ;;  %v1369_v9 = vpop.f32.mrb[39].mxu0 }
0x1600   :  { %v1999_v29 = vmul.f32 -1.442695, %v1372_v28 }
0x1601   :  { %2302 = vpow2.f32 %v1998_v58 }
0x1602   :  { %2304 = vtanh.f32 %v1372_v28 }
0x160b   :  { %v2303_v12 = vpop.eup %2302 }
0x160c   :  { %v1376_v11 = vadd.f32 1.0, %v2303_v12  ;;  %v2305_v13 = vpop.eup %2304 }
0x160e   :  { %2306 = vrcp.f32 %v1376_v11 }
0x160f   :  { %2308 = vpow2.f32 %v1999_v29  ;;  %v2571_v29 = vmov 0.0  }
0x1610   :  { %2051 = vmatprep.subr.bf16.mxu0 %v2571_v29 }
0x1618   :  { %v2307_v37 = vpop.eup %2306 }
0x1619   :  { %v1387_v19 = vmul.f32 %v2307_v37, %v2305_v13  ;;  %v2309_v30 = vpop.eup %2308  ;;  %v1386_v4 = vmul.f32 %v2307_v37, %v3154_v10 }
0x161a   :  { %v1383_v24 = vadd.f32 1.0, %v2309_v30  ;;  %v1614_v30 = vld [vmem:[#allocation4] sm:$0xf] }
0x161b   :  { %1389 = vrot.lane.b32.xlu0 %v1387_v19, %s2564_s5  ;;  %v2146_v19 = vld [vmem:[#allocation13] sm:$0xff]  }
0x161c   :  { %2310 = vrcp.f32 %v1383_v24 }
0x1626   :  { %v2311_v33 = vpop.eup %2310 }
0x168d   :  { %v1390_v16 = vpop.permute.xlu0 %1389 }
0x168e   :  { %v3226_v18 = vadd.f32 %v1390_v16, %v1386_v4 }
0x1690   :  { %2312 = vtanh.f32 %v3226_v18 }
0x169a   :  { %v2313_v46 = vpop.eup %2312 }
0x169b   :  { %v1394_v55 = vmul.f32 %v2313_v46, %v2311_v33 }
0x169d   :  { %v2034_v59 = vpack.c.bf16 %v1394_v55, %v1394_v55 }
0x169f   :  { %1399 = vrot.lane.b32.xlu1 %v2034_v59, %s2564_s5 }
0x1711   :  { %v1400_v51 = vpop.permute.xlu1 %1399 }
0x1712   :  { %1402 = vst.msk [vmem:[#allocation3] sm:$0xf] %vm450_vm2, %v1400_v51 }
0x1719   :  { %v1403_v34 = vld [vmem:[#allocation3] sm:$0xf] }
0x171a   :  { %1437 = vmatmul.mubr.bf16.vlgmr.msra.gmra.mrb[40].mxu0 %v1403_v34 }
0x171b   :  { %2053 = vmatprep.mubr.msk.bf16.mxu0 %vm2572_vm4, %v2571_v29  ;;  %2052 = vmatpush3.bf16.msra.mxu0 %v2146_v19 }
0x171c   :  { %2057 = vmatprep.subr.bf16.mxu0 %v2571_v29 }
0x1722   :  { %2054 = vmatmul.mubr.msk.bf16.vlgmr.msra.gmra.mrb[44].mxu0 %vm192_vm0, %v1614_v30 }
0x1723   :  { %2061 = vmatprep.mubr.msk.bf16.mxu0 %vm2572_vm4, %v2571_v29 }
0x17ed   :  { %v1438_v21 = vpop.f32.mrb[40].mxu0 }
0x17ee   :  { %v1439_v10 = vadd.f32 %v1438_v21, %v2917_v36  ;;  %v1440_v17 = vpop.f32.mrb[41].mxu0 }
0x17ef   :  { %v1442_v35 = vpop.f32.mrb[42].mxu0  ;;  %v1441_v14 = vadd.f32 %v1440_v17, %v2922_v56  ;;  %v2148_v17 = vld [vmem:[#allocation15] sm:$0xff]  }
0x17f0   :  { %v2001_v60 = vmul.f32 -1.442695, %v1439_v10  ;;  %v1443_v1 = vpop.f32.mrb[43].mxu0  ;;  %2058 = vmatpush3.bf16.msra.mxu0 %v2148_v17  ;;  %v2149_v35 = vld [vmem:[#allocation15 + $0x8] sm:$0xff]  }
0x17f1   :  { %v2002_v41 = vmul.f32 -1.442695, %v1441_v14  ;;  %2059 = vmatprep.subr.bf16.mxu0 %v2571_v29 }
0x17f2   :  { %2314 = vpow2.f32 %v2001_v60 }
0x17f3   :  { %2316 = vtanh.f32 %v1441_v14 }
0x17f4   :  { %2060 = vmatpush3.bf16.msra.mxu0 %v2149_v35 }
0x17f5   :  { %2065 = vmatprep.subr.bf16.mxu0 %v2571_v29 }
0x17fc   :  { %v2315_v15 = vpop.eup %2314 }
0x17fd   :  { %v1448_v61 = vadd.f32 1.0, %v2315_v15  ;;  %v2317_v38 = vpop.eup %2316 }
0x17ff   :  { %2318 = vrcp.f32 %v1448_v61 }
0x1800   :  { %2320 = vpow2.f32 %v2002_v41  ;;  %v2151_v41 = vld [vmem:[%s3346_s9 + $0x8] sm:$0xff]  }
0x1809   :  { %v2319_v54 = vpop.eup %2318 }
0x180a   :  { %v1459_v2 = vmul.f32 %v2319_v54, %v2317_v38  ;;  %v2321_v26 = vpop.eup %2320  ;;  %v1458_v52 = vmul.f32 %v2319_v54, %v3171_v57  ;;  %v276_v57 = vadd.f32 %v2903_v32, %v2805_v22  ;;  %v2150_v38 = vld [vmem:[%s3346_s9] sm:$0xff]  }
0x180b   :  { %v1455_v6 = vadd.f32 1.0, %v2321_v26  ;;  %v2152_v26 = vld [vmem:[%s3346_s9 + $0x10] sm:$0xff]  }
0x180c   :  { %1461 = vrot.lane.b32.xlu0 %v1459_v2, %s2564_s5 }
0x180d   :  { %2322 = vrcp.f32 %v1455_v6  ;;  %v2153_v6 = vld [vmem:[%s3346_s9 + $0x18] sm:$0xff]  }
0x1817   :  { %v2323_v5 = vpop.eup %2322 }
0x187e   :  { %v1462_v53 = vpop.permute.xlu0 %1461 }
0x187f   :  { %v3235_v63 = vadd.f32 %v1462_v53, %v1458_v52 }
0x1881   :  { %2324 = vtanh.f32 %v3235_v63 }
0x188b   :  { %v2325_v27 = vpop.eup %2324 }
0x188c   :  { %v1466_v28 = vmul.f32 %v2325_v27, %v2323_v5 }
0x188e   :  { %v1467_v23 = vpack.c.bf16 %v1466_v28, %v1466_v28 }
0x1890   :  { %1468 = vst.msk [vmem:[#allocation3] sm:$0xf] %vm597_vm3, %v1467_v23 }
0x1897   :  { %v1471_v58 = vld [vmem:[#allocation3] sm:$0xf] }
0x1898   :  { %2003 = vmatmul.mubr.msk.bf16.vlgmr.msra.gmra.mrb[28].mxu1 %vm374_vm1, %v1471_v58 }
0x1899   :  { %1550 = vmatpush1.bf16.msra.mxu1 %v3176_v8  ;;  %1581 = vmatprep.mubr.bf16.mxu1 %v2570_v0  ;;  %v274_v0 = vadd.f32 %v2901_v31, %v2799_v20 }
0x189a   :  { %1551 = vmatprep.subr.bf16.mxu1 %v3180_v25 }
0x189d   :  { %1552 = vmatpush1.bf16.msra.mxu1 %v3183_v3 }
0x189e   :  { %1553 = vmatprep.subr.bf16.mxu1 %v3186_v7 }
0x18a1   :  { %1554 = vmatpush1.bf16.msra.mxu1 %v3189_v39 }
0x18a2   :  { %1555 = vmatprep.subr.bf16.mxu1 %v3192_v40 }
0x18a5   :  { %1556 = vmatpush1.bf16.msra.mxu1 %v3195_v42 }
0x18a6   :  { %1557 = vmatprep.subr.bf16.mxu1 %v3198_v43 }
0x18a9   :  { %1558 = vmatpush1.bf16.msra.mxu1 %v3201_v44 }
0x18aa   :  { %1559 = vmatprep.subr.bf16.mxu1 %v3204_v45 }
0x18ad   :  { %1560 = vmatpush1.bf16.msra.mxu1 %v3207_v47 }
0x18ae   :  { %1561 = vmatprep.subr.bf16.mxu1 %v3210_v48 }
0x18b1   :  { %1562 = vmatpush1.bf16.msra.mxu1 %v2870_v62 }
0x18b2   :  { %1563 = vmatprep.subr.bf16.mxu1 %v3214_v49 }
0x18b5   :  { %1564 = vmatpush1.bf16.msra.mxu1 %v3217_v50 }
0x18b6   :  { %2077 = vmatprep.subr.bf16.mxu1 %v2571_v29 }
0x196b   :  { %v1509_v8 = vpop.f32.mrb[28].mxu1 }
0x196c   :  { %v1516_v25 = vadd.f32 %v1509_v8, %v274_v0  ;;  %v1511_v3 = vpop.f32.mrb[29].mxu1 }
0x196d   :  { %v1517_v7 = vadd.f32 %v1511_v3, %v276_v57  ;;  %v1513_v39 = vpop.f32.mrb[30].mxu1 }
0x196e   :  { %v2004_v40 = vmul.f32 -1.442695, %v1516_v25  ;;  %v1514_v42 = vpop.f32.mrb[31].mxu1  ;;  %v2154_v25 = vld [vmem:[%s3349_s12] sm:$0xff]  }
0x196f   :  { %v2005_v20 = vmul.f32 -1.442695, %v1517_v7 }
0x1970   :  { %2326 = vpow2.f32 %v2004_v40 }
0x1971   :  { %2328 = vtanh.f32 %v1517_v7 }
0x197a   :  { %v2327_v43 = vpop.eup %2326 }
0x197b   :  { %v1521_v62 = vadd.f32 1.0, %v2327_v43  ;;  %v2329_v44 = vpop.eup %2328  ;;  %v2156_v43 = vld [vmem:[%s3349_s12 + $0x10] sm:$0xff]  }
0x197d   :  { %2330 = vrcp.f32 %v1521_v62  ;;  %v2157_v62 = vld [vmem:[%s3349_s12 + $0x18] sm:$0xff]  }
0x197e   :  { %2332 = vpow2.f32 %v2005_v20 }
0x1987   :  { %v2331_v45 = vpop.eup %2330 }
0x1988   :  { %v1532_v47 = vmul.f32 %v2331_v45, %v2329_v44  ;;  %v2333_v22 = vpop.eup %2332  ;;  %v1531_v32 = vmul.f32 %v2331_v45, %v3226_v18  ;;  %v2021_v45 = vld [vmem:[%s3348_s11] ss:$0 sm:$0xff] }
0x1989   :  { %v1528_v31 = vadd.f32 1.0, %v2333_v22 }
0x198a   :  { %1534 = vrot.lane.b32.xlu1 %v1532_v47, %s2564_s5 }
0x198b   :  { %2334 = vrcp.f32 %v1528_v31 }
0x1995   :  { %v2335_v50 = vpop.eup %2334 }
0x19fc   :  { %v1535_v48 = vpop.permute.xlu1 %1534 }
0x19fd   :  { %v1537_v49 = vadd.f32 %v1535_v48, %v1531_v32 }
0x19ff   :  { %2336 = vtanh.f32 %v1537_v49 }
0x1a09   :  { %v2337_v9 = vpop.eup %2336 }
0x1a0a   :  { %v1539_v12 = vmul.f32 %v2337_v9, %v2335_v50  ;;  %v2022_v50 = vld [vmem:[%s3350_s13] ss:$0 sm:$0xff] }
0x1a0c   :  { %v2035_v11 = vpack.c.bf16 %v1539_v12, %v1539_v12 }
0x1a0e   :  { %1544 = vrot.lane.b32.xlu0 %v2035_v11, %s2564_s5 }
0x1a80   :  { %v1545_v13 = vpop.permute.xlu0 %1544 }
0x1a81   :  { %1547 = vst.msk [vmem:[#allocation3] sm:$0xf] %vm450_vm2, %v1545_v13 }
0x1a88   :  { %v1548_v37 = vld [vmem:[#allocation3] sm:$0xf] }
0x1a89   :  { %1582 = vmatmul.mubr.bf16.vlgmr.msra.gmra.mrb[32].mxu1 %v1548_v37 }
0x1a8a   :  { %2085 = vmatprep.mubr.msk.bf16.mxu1 %vm2572_vm4, %v2571_v29  ;;  %2078 = vmatpush3.bf16.msra.mxu1 %v2154_v25 }
0x1a8b   :  { %2079 = vmatprep.subr.bf16.mxu1 %v2571_v29 }
0x1b5c   :  { %v1583_v24 = vpop.f32.mrb[32].mxu1 }
0x1b5d   :  { %v1584_v4 = vadd.f32 %v1583_v24, %v2917_v36  ;;  %v1585_v16 = vpop.f32.mrb[33].mxu1  ;;  %v2009_v36 = vld [vmem:[%s3345_s8] ss:$0 sm:$0xff] }
0x1b5e   :  { %v1587_v18 = vpop.f32.mrb[34].mxu1  ;;  %v1586_v55 = vadd.f32 %v1585_v16, %v2922_v56  ;;  %v1667_v56 = vpop.f32.mrb[44].mxu0 }
0x1b5f   :  { %v2007_v33 = vmul.f32 -1.442695, %v1584_v4  ;;  %v1588_v46 = vpop.f32.mrb[35].mxu1  ;;  %v1668_v60 = vadd.f32 %v2009_v36, %v1667_v56  ;;  %v2055_v1 = vpop.f32.mrb[45].mxu0 }
0x1b60   :  { %v1670_v14 = vpop.f32.mrb[46].mxu0  ;;  %v2008_v2 = vmul.f32 -1.442695, %v1586_v55 }
0x1b61   :  { %2338 = vpow2.f32 %v2007_v33  ;;  %v1673_v15 = vmax.f32 %v1668_v60, 0.0  ;;  %v2056_v61 = vpop.f32.mrb[47].mxu0 }
0x1b62   :  { %2340 = vtanh.f32 %v1586_v55 }
0x1b63   :  { %v1683_v54 = vpack.c.bf16 %v1673_v15, %v1673_v15 }
0x1b65   :  { %2062 = vmatmul.mubr.msk.bf16.vlgmr.msra.gmra.mrb[48].mxu0 %vm1700_vm5, %v1683_v54 }
0x1b66   :  { %2066 = vmatpush3.bf16.msra.mxu0 %v2150_v38  ;;  %2073 = vmatprep.mubr.msk.bf16.mxu0 %vm2572_vm4, %v2571_v29 }
0x1b67   :  { %2067 = vmatprep.subr.bf16.mxu0 %v2571_v29 }
0x1b6a   :  { %2068 = vmatpush3.bf16.msra.mxu0 %v2151_v41 }
0x1b6b   :  { %v2339_v59 = vpop.eup %2338  ;;  %2069 = vmatprep.subr.bf16.mxu0 %v2571_v29 }
0x1b6c   :  { %v1593_v51 = vadd.f32 1.0, %v2339_v59  ;;  %v2341_v34 = vpop.eup %2340 }
0x1b6e   :  { %2342 = vrcp.f32 %v1593_v51  ;;  %2070 = vmatpush3.bf16.msra.mxu0 %v2152_v26 }
0x1b6f   :  { %2344 = vpow2.f32 %v2008_v2  ;;  %2071 = vmatprep.subr.bf16.mxu0 %v2571_v29 }
0x1b72   :  { %2072 = vmatpush3.bf16.msra.mxu0 %v2153_v6 }
0x1b78   :  { %v2343_v21 = vpop.eup %2342 }
0x1b79   :  { %v1604_v10 = vmul.f32 %v2343_v21, %v2341_v34  ;;  %v2345_v52 = vpop.eup %2344  ;;  %v1603_v5 = vmul.f32 %v2343_v21, %v3235_v63  ;;  %v2155_v63 = vld [vmem:[%s3349_s12 + $0x8] sm:$0xff]   ;;  %s2573_s12 = smov [#allocation16]  }
0x1b7a   :  { %v1600_v53 = vadd.f32 1.0, %v2345_v52  ;;  %2080 = vmatpush3.bf16.msra.mxu1 %v2155_v63  ;;  %s1915_s2 = sshll.u32 %s2573_s12, 4  ;;  %s1916_s2 = int_to_ptr.vmem [resolvable:$true] %s1915_s2 }
0x1b7b   :  { %1606 = vrot.lane.b32.xlu1 %v1604_v10, %s2564_s5  ;;  %2081 = vmatprep.subr.bf16.mxu1 %v2571_v29  ;;  %s2527_s11 = scalar_lea.vmem %s1916_s2, 128  ;;  %p2532_p1 = scmp.lt.s32.totalorder %s1916_s2, %s1916_s2 }
0x1b7c   :  { %2346 = vrcp.f32 %v1600_v53  ;;  %p2528_p0 = scmp.ne.s32.totalorder %s1916_s2, %s2527_s11  ;;  %p2533_p2 = scmp.lt.s32.totalorder %s2527_s11, %s2527_s11 }
0x1b7e   :  { %2082 = vmatpush3.bf16.msra.mxu1 %v2156_v43  ;;  %p2534_p3 = por %p2533_p2, %p2532_p1 }
0x1b7f   :  { %2083 = vmatprep.subr.bf16.mxu1 %v2571_v29 }
0x1b80   :  { %p2535_p4 = pnand %p2534_p3, %p2528_p0 }
0x1b82   :  { %2084 = vmatpush3.bf16.msra.mxu1 %v2157_v62 }
0x1b86   :  { %v2347_v23 = vpop.eup %2346 }
0x1bed   :  { %v1607_v27 = vpop.permute.xlu1 %1606 }
0x1bee   :  { %v1609_v28 = vadd.f32 %v1607_v27, %v1603_v5 }
0x1bf0   :  { %2348 = vtanh.f32 %v1609_v28 }
0x1bfa   :  { %v2349_v58 = vpop.eup %2348 }
0x1bfb   :  { %v1611_v0 = vmul.f32 %v2349_v58, %v2347_v23 }
0x1bfd   :  { %v1612_v57 = vpack.c.bf16 %v1611_v0, %v1611_v0 }
0x1bff   :  { %1613 = vst.msk [vmem:[#allocation3] sm:$0xf] %vm597_vm3, %v1612_v57 }
0x1c06   :  { %v2147_v8 = vld [vmem:[#allocation3] ss:$0 sps:$4 sm:$0xff]  }
0x1c07   :  { %1747 = vrot.lane.b32.xlu0 %v2147_v8, %s2564_s5 }
0x1c38   :  { %v1738_v7 = vpop.f32.mrb[48].mxu0 }
0x1c39   :  { %v2063_v39 = vpop.f32.mrb[49].mxu0 }
0x1c3a   :  { %v1741_v40 = vpop.f32.mrb[50].mxu0 }
0x1c3b   :  { %v2064_v42 = vpop.f32.mrb[51].mxu0 }
0x1c79   :  { %v1748_v3 = vpop.permute.xlu0 %1747 }
0x1c7a   :  { %2074 = vmatmul.mubr.msk.bf16.vlgmr.msra.gmra.mrb[52].mxu0 %vm374_vm1, %v1748_v3 }
0x1d4d   :  { %v1810_v44 = vpop.f32.mrb[52].mxu0 }
0x1d4e   :  { %v1811_v47 = vadd.f32 %v1810_v44, %v1738_v7  ;;  %v2075_v20 = vpop.f32.mrb[53].mxu0 }
0x1d4f   :  { %v1813_v22 = vpop.f32.mrb[54].mxu0 }
0x1d50   :  { %v1823_v31 = vadd.f32 %v2021_v45, %v1811_v47  ;;  %v2076_v32 = vpop.f32.mrb[55].mxu0 }
0x1d52   :  { %v1824_v48 = vmax.f32 %v1823_v31, 0.0 }
0x1d54   :  { %v1825_v49 = vpack.c.bf16 %v1824_v48, %v1824_v48 }
0x1d56   :  { %2086 = vmatmul.mubr.msk.bf16.vlgmr.msra.gmra.mrb[36].mxu1 %vm374_vm1, %v1825_v49 }
0x1e29   :  { %v1902_v9 = vpop.f32.mrb[36].mxu1 }
0x1e2a   :  { %v1903_v12 = vadd.f32 %v2022_v50, %v1902_v9  ;;  %v2087_v11 = vpop.f32.mrb[37].mxu1 }
0x1e2b   :  { %v1905_v13 = vpop.f32.mrb[38].mxu1 }
0x1e2c   :  { %1908 = vst [vmem:[#allocation16] sm:$0xff] %v1903_v12  ;;  %v2088_v37 = vpop.f32.mrb[39].mxu1 }
0x1e2d   :  { %2538 = shalt.err (!%p2535_p4)
}
0x1e2e   :  { %s2539_s13 = scalar_lea.hbm %s3351_s14, 128 }
0x1e2f   :  { %p2540_p5 = scmp.ne.s32.totalorder %s3351_s14, %s2539_s13  ;;  %p2543_p6 = scmp.lt.u32.totalorder %s2539_s13, %s3351_s14 }
0x1e31   :  { %p2545_p7 = pnand %p2543_p6, %p2540_p5 }
0x1e33   :  { %2548 = shalt.err (!%p2545_p7)
}
0x1e34   :  { %1918 = dma.vmem_to_hbm [thread:$0]  %s1916_s2, 128, %s3351_s14, [#allocation6]  }
0x1e35   :  { %2557 = dma.done.wait [#allocation6], 128  }
0x1e36   :  { %2558 = vsyncadd [#allocation6], 4294967168 }
0x1e37   :  { %1922 = vsyncpa [#allocation5], 1 }
0x1e38   :  { %1923 = vsyncpa [#allocation8], 1 }
0x1e39   :  { %1924 = vsyncpa [#allocation11], 1 }
0x1e3a   :  { %1925 = vsyncpa [#allocation14], 1 }
0x1e3b   :  { %1926 = vsyncpa [#allocation6], 1 }

</bundles_post_ra>
